<compile_context>
chip_gen: v6e
topology: v6e:2x2x1
jax: 0.10.0
libtpu: 0.0.40
codegen_flags: <defaults>
</compile_context>

<pallas_src>
import jax
import jax.numpy as jnp
from jax.experimental import pallas as pl
from jax.experimental.pallas import tpu as pltpu

IN_FEATURES = 28 * 28          # 784
HIDDEN = 512
OUT_Y = 10
OUT_Z = 5
OUT_PAD = 128                  # fused, lane-padded head width (cols 0..9=y, 10..14=z)


def _round_up(n, m):
    return ((n + m - 1) // m) * m


def _device_config():
    """Generation-specific tiling knobs (trace-time Python; safe fallback)."""
    kind = jax.devices()[0].device_kind.lower()
    if any(t in kind for t in ("v5 lite", "v5e", "v6 lite", "v6e", "v6")):
        # Single TC, 128 MiB physical VMEM: big tiles amortize ~0.35us/step
        # pipeline overhead and improve MXU M-dim utilization.
        return dict(max_tile=2048, split_cores=False, vmem_limit=100 * 1024 * 1024)
    if "v7" in kind:
        # 2 TCs / 64 MiB VMEM: smaller tiles, ensure >=2 grid steps so the
        # "parallel" batch axis can shard across both cores.
        return dict(max_tile=512, split_cores=True, vmem_limit=None)
    # Unknown / other generations: conservative defaults.
    return dict(max_tile=512, split_cores=False, vmem_limit=None)


def _tile_plan(b, cfg):
    """Pick a batch tile (multiple of 8) and a padded batch it divides evenly."""
    b8 = _round_up(b, 8)
    max_tile = cfg["max_tile"]
    if cfg["split_cores"] and b8 > 256:
        tb = min(max_tile, _round_up(pl.cdiv(b8, 2), 8))   # >=2 grid steps on v7x
    else:
        tb = min(b8, max_tile)
    b_pad = _round_up(b8, tb)                               # no ragged last block
    return tb, b_pad


def _mlp_kernel(x_ref, w1_ref, b1_ref, w2_ref, b2_ref, wh_ref, bh_ref, out_ref):
    # One batch tile per grid step. bf16 x bf16 -> f32 accumulate on the MXU.
    x = x_ref[...].astype(jnp.bfloat16)                               # (TB, 784)

    h = jnp.dot(x, w1_ref[...], preferred_element_type=jnp.float32) + b1_ref[...]
    h = jnp.maximum(h, 0.0)                                           # (TB, 512) f32

    h = jnp.dot(h.astype(jnp.bfloat16), w2_ref[...],
                preferred_element_type=jnp.float32) + b2_ref[...]
    h = jnp.maximum(h, 0.0)                                           # (TB, 512) f32

    out = jnp.dot(h.astype(jnp.bfloat16), wh_ref[...],
                  preferred_element_type=jnp.float32) + bh_ref[...]   # (TB, 128) f32
    out_ref[...] = out.astype(out_ref.dtype)                          # bf16 writeback


def prepare_params(params, weight_dtype=jnp.bfloat16):
    """One-time packing (call once, NOT per forward): fuse the two heads into a
    single 128-lane matmul and cast weights to bf16 (quantizes vs f32 torch
    weights; acceptable for DQN inference)."""
    w_head = jnp.concatenate([params["w3"], params["w4"]], axis=1)     # (512, 15)
    w_head = jnp.pad(w_head, ((0, 0), (0, OUT_PAD - OUT_Y - OUT_Z)))   # (512, 128)
    b_head = jnp.concatenate([params["b3"], params["b4"]])
    b_head = jnp.pad(b_head, (0, OUT_PAD - OUT_Y - OUT_Z))
    return {
        "w1": params["w1"].astype(weight_dtype),                       # (784, 512)
        "b1": params["b1"].reshape(1, HIDDEN).astype(jnp.float32),
        "w2": params["w2"].astype(weight_dtype),                       # (512, 512)
        "b2": params["b2"].reshape(1, HIDDEN).astype(jnp.float32),
        "wh": w_head.astype(weight_dtype),                             # (512, 128)
        "bh": b_head.reshape(1, OUT_PAD).astype(jnp.float32),
    }


@jax.jit
def func_neural_network(x_nchw, prepared):
    """Forward pass. x_nchw: (B, 1, 28, 28) float32 (NCHW, as in PyTorch).
    Returns (y, z) with shapes (B, 10), (B, 5), float32."""
    b = x_nchw.shape[0]
    # nn.Flatten() on NCHW == row-major reshape to (B, C*H*W)
    x = x_nchw.reshape(b, IN_FEATURES).astype(jnp.float32)

    cfg = _device_config()
    tb, b_pad = _tile_plan(b, cfg)
    if b_pad != b:
        x = jnp.pad(x, ((0, b_pad - b), (0, 0)))          # zero rows, sliced off below
    grid = (b_pad // tb,)

    w_bytes = sum(int(v.size) * v.dtype.itemsize for v in prepared.values())
    cost = pl.CostEstimate(
        flops=2 * b_pad * (IN_FEATURES * HIDDEN + HIDDEN * HIDDEN + HIDDEN * OUT_PAD),
        transcendentals=0,
        bytes_accessed=w_bytes + b_pad * IN_FEATURES * 4 + b_pad * OUT_PAD * 2,
    )

    # Weights/biases: constant block index -> fetched once, VMEM-resident.
    resident = lambda shape: pl.BlockSpec(shape, lambda i: (0, 0))

    compiler_kwargs = dict(dimension_semantics=("parallel",))   # TC sharding of batch
    if cfg["vmem_limit"] is not None:
        compiler_kwargs["vmem_limit_bytes"] = cfg["vmem_limit"]

    out = pl.pallas_call(
        _mlp_kernel,
        out_shape=jax.ShapeDtypeStruct((b_pad, OUT_PAD), jnp.bfloat16),
        grid_spec=pl.GridSpec(
            grid=grid,
            in_specs=[
                pl.BlockSpec((tb, IN_FEATURES), lambda i: (i, 0)),   # x (streamed)
                resident((IN_FEATURES, HIDDEN)),                     # w1 (bf16)
                resident((1, HIDDEN)),                               # b1 (f32)
                resident((HIDDEN, HIDDEN)),                          # w2 (bf16)
                resident((1, HIDDEN)),                               # b2 (f32)
                resident((HIDDEN, OUT_PAD)),                         # fused head W (bf16)
                resident((1, OUT_PAD)),                              # fused head b (f32)
            ],
            out_specs=pl.BlockSpec((tb, OUT_PAD), lambda i: (i, 0)),
        ),
        compiler_params=pltpu.CompilerParams(**compiler_kwargs),
        cost_estimate=cost,
    )(x, prepared["w1"], prepared["b1"], prepared["w2"], prepared["b2"],
      prepared["wh"], prepared["bh"])

    out = out[:b]
    y = out[:, :OUT_Y].astype(jnp.float32)
    z = out[:, OUT_Y:OUT_Y + OUT_Z].astype(jnp.float32)
    return y, z


def init_params(key):
    """Deterministic synthetic parameters (same shapes as the torch module),
    stored in (in_features, out_features) layout, f32."""
    ks = jax.random.split(key, 8)
    scale = lambda fan_in: 1.0 / jnp.sqrt(jnp.float32(fan_in))
    return {
        "w1": jax.random.uniform(ks[0], (IN_FEATURES, HIDDEN), jnp.float32,
                                 -scale(IN_FEATURES), scale(IN_FEATURES)),
        "b1": jax.random.uniform(ks[1], (HIDDEN,), jnp.float32,
                                 -scale(IN_FEATURES), scale(IN_FEATURES)),
        "w2": jax.random.uniform(ks[2], (HIDDEN, HIDDEN), jnp.float32,
                                 -scale(HIDDEN), scale(HIDDEN)),
        "b2": jax.random.uniform(ks[3], (HIDDEN,), jnp.float32,
                                 -scale(HIDDEN), scale(HIDDEN)),
        "w3": jax.random.uniform(ks[4], (HIDDEN, OUT_Y), jnp.float32,
                                 -scale(HIDDEN), scale(HIDDEN)),
        "b3": jax.random.uniform(ks[5], (OUT_Y,), jnp.float32,
                                 -scale(HIDDEN), scale(HIDDEN)),
        "w4": jax.random.uniform(ks[6], (HIDDEN, OUT_Z), jnp.float32,
                                 -scale(HIDDEN), scale(HIDDEN)),
        "b4": jax.random.uniform(ks[7], (OUT_Z,), jnp.float32,
                                 -scale(HIDDEN), scale(HIDDEN)),
    }


def _reference(x_nchw, prepared):
    """Plain-JAX reference mirroring the kernel's bf16-input / f32-accumulate /
    bf16-writeback arithmetic (tests the kernel, not the bf16 quantization)."""
    x = x_nchw.reshape(x_nchw.shape[0], IN_FEATURES).astype(jnp.float32)
    x = x.astype(jnp.bfloat16)
    h = jnp.maximum(jnp.dot(x, prepared["w1"],
                            preferred_element_type=jnp.float32) + prepared["b1"], 0.0)
    h = jnp.maximum(jnp.dot(h.astype(jnp.bfloat16), prepared["w2"],
                            preferred_element_type=jnp.float32) + prepared["b2"], 0.0)
    out = (jnp.dot(h.astype(jnp.bfloat16), prepared["wh"],
                   preferred_element_type=jnp.float32) + prepared["bh"]
           ).astype(jnp.bfloat16)
    return (out[:, :OUT_Y].astype(jnp.float32),
            out[:, OUT_Y:OUT_Y + OUT_Z].astype(jnp.float32))


if __name__ == "__main__":
    key = jax.random.PRNGKey(0)
    k_x, k_x2, k_p = jax.random.split(key, 3)

    params = init_params(k_p)
    prepared = prepare_params(params)        # one-time pack/fuse/cast

    # Aligned small batch.
    batch = 8
    x = jax.random.normal(k_x, (batch, 1, 28, 28), jnp.float32)   # NCHW
    y, z = func_neural_network(x, prepared)
    y, z = jax.block_until_ready((y, z))
    y_ref, z_ref = _reference(x, prepared)
    assert y.shape == (batch, OUT_Y) and z.shape == (batch, OUT_Z)
    assert jnp.allclose(y, y_ref, atol=2e-2, rtol=2e-2)
    assert jnp.allclose(z, z_ref, atol=2e-2, rtol=2e-2)

    # Unaligned batch exercises the pad-to-tile path (no ragged block).
    batch2 = 13
    x2 = jax.random.normal(k_x2, (batch2, 1, 28, 28), jnp.float32)
    y2, z2 = jax.block_until_ready(func_neural_network(x2, prepared))
    y2_ref, z2_ref = _reference(x2, prepared)
    assert y2.shape == (batch2, OUT_Y) and z2.shape == (batch2, OUT_Z)
    assert jnp.allclose(y2, y2_ref, atol=2e-2, rtol=2e-2)
    assert jnp.allclose(z2, z2_ref, atol=2e-2, rtol=2e-2)

    print("KERNEL_OK")
</pallas_src>

<mosaic_0001>
module attributes {stable_mosaic.version = 11 : i64} {
  func.func @_mlp_kernel(%arg0: i32, %arg1: memref<8x784xf32, #tpu.memory_space<vmem>>, %arg2: memref<784x512xbf16, #tpu.memory_space<vmem>>, %arg3: memref<1x512xf32, #tpu.memory_space<vmem>>, %arg4: memref<512x512xbf16, #tpu.memory_space<vmem>>, %arg5: memref<1x512xf32, #tpu.memory_space<vmem>>, %arg6: memref<512x128xbf16, #tpu.memory_space<vmem>>, %arg7: memref<1x128xf32, #tpu.memory_space<vmem>>, %arg8: memref<8x128xbf16, #tpu.memory_space<vmem>>) attributes {dimension_semantics = [#tpu.dimension_semantics<parallel>], iteration_bounds = array<i64: 1>, scalar_prefetch = 0 : i64, scratch_operands = 0 : i64, tpu.core_type = #tpu.core_type<tc>, window_params = [{transform_indices = @transform_0, window_bounds = array<i64: 8, 784>}, {pipeline_mode = #tpu.pipeline_mode<synchronous>, transform_indices = @transform_1, window_bounds = array<i64: 784, 512>}, {pipeline_mode = #tpu.pipeline_mode<synchronous>, transform_indices = @transform_2, window_bounds = array<i64: 1, 512>}, {pipeline_mode = #tpu.pipeline_mode<synchronous>, transform_indices = @transform_3, window_bounds = array<i64: 512, 512>}, {pipeline_mode = #tpu.pipeline_mode<synchronous>, transform_indices = @transform_4, window_bounds = array<i64: 1, 512>}, {pipeline_mode = #tpu.pipeline_mode<synchronous>, transform_indices = @transform_5, window_bounds = array<i64: 512, 128>}, {pipeline_mode = #tpu.pipeline_mode<synchronous>, transform_indices = @transform_6, window_bounds = array<i64: 1, 128>}, {transform_indices = @transform_7, window_bounds = array<i64: 8, 128>}]} {
    %c0 = arith.constant 0 : index
    %c0_0 = arith.constant 0 : index
    %0 = vector.load %arg1[%c0, %c0_0] : memref<8x784xf32, #tpu.memory_space<vmem>>, vector<8x784xf32>
    %1 = arith.truncf %0 : vector<8x784xf32> to vector<8x784xbf16>
    %c0_1 = arith.constant 0 : index
    %c0_2 = arith.constant 0 : index
    %2 = vector.load %arg2[%c0_1, %c0_2] : memref<784x512xbf16, #tpu.memory_space<vmem>>, vector<784x512xbf16>
    %cst = arith.constant dense<0.000000e+00> : vector<8x512xf32>
    %3 = tpu.matmul %1, %2, %cst {dimension_numbers = #tpu.dot_dimension_numbers<[1], [0], [0], [1], [0, 0, 1, 1], [], []>} : vector<8x784xbf16>, vector<784x512xbf16>, vector<8x512xf32> -> vector<8x512xf32>
    %c0_3 = arith.constant 0 : index
    %c0_4 = arith.constant 0 : index
    %4 = vector.load %arg3[%c0_3, %c0_4] : memref<1x512xf32, #tpu.memory_space<vmem>>, vector<1x512xf32>
    %5 = vector.broadcast %4 : vector<1x512xf32> to vector<8x512xf32>
    %6 = arith.addf %3, %5 : vector<8x512xf32>
    %cst_5 = arith.constant 0.000000e+00 : f32
    %7 = vector.broadcast %cst_5 : f32 to vector<8x512xf32>
    %8 = arith.maximumf %6, %7 : vector<8x512xf32>
    %9 = arith.truncf %8 : vector<8x512xf32> to vector<8x512xbf16>
    %c0_6 = arith.constant 0 : index
    %c0_7 = arith.constant 0 : index
    %10 = vector.load %arg4[%c0_6, %c0_7] : memref<512x512xbf16, #tpu.memory_space<vmem>>, vector<512x512xbf16>
    %cst_8 = arith.constant dense<0.000000e+00> : vector<8x512xf32>
    %11 = tpu.matmul %9, %10, %cst_8 {dimension_numbers = #tpu.dot_dimension_numbers<[1], [0], [0], [1], [0, 0, 1, 1], [], []>} : vector<8x512xbf16>, vector<512x512xbf16>, vector<8x512xf32> -> vector<8x512xf32>
    %c0_9 = arith.constant 0 : index
    %c0_10 = arith.constant 0 : index
    %12 = vector.load %arg5[%c0_9, %c0_10] : memref<1x512xf32, #tpu.memory_space<vmem>>, vector<1x512xf32>
    %13 = vector.broadcast %12 : vector<1x512xf32> to vector<8x512xf32>
    %14 = arith.addf %11, %13 : vector<8x512xf32>
    %cst_11 = arith.constant 0.000000e+00 : f32
    %15 = vector.broadcast %cst_11 : f32 to vector<8x512xf32>
    %16 = arith.maximumf %14, %15 : vector<8x512xf32>
    %17 = arith.truncf %16 : vector<8x512xf32> to vector<8x512xbf16>
    %c0_12 = arith.constant 0 : index
    %c0_13 = arith.constant 0 : index
    %18 = vector.load %arg6[%c0_12, %c0_13] : memref<512x128xbf16, #tpu.memory_space<vmem>>, vector<512x128xbf16>
    %cst_14 = arith.constant dense<0.000000e+00> : vector<8x128xf32>
    %19 = tpu.matmul %17, %18, %cst_14 {dimension_numbers = #tpu.dot_dimension_numbers<[1], [0], [0], [1], [0, 0, 1, 1], [], []>} : vector<8x512xbf16>, vector<512x128xbf16>, vector<8x128xf32> -> vector<8x128xf32>
    %c0_15 = arith.constant 0 : index
    %c0_16 = arith.constant 0 : index
    %20 = vector.load %arg7[%c0_15, %c0_16] : memref<1x128xf32, #tpu.memory_space<vmem>>, vector<1x128xf32>
    %21 = vector.broadcast %20 : vector<1x128xf32> to vector<8x128xf32>
    %22 = arith.addf %19, %21 : vector<8x128xf32>
    %23 = arith.truncf %22 : vector<8x128xf32> to vector<8x128xbf16>
    %c0_17 = arith.constant 0 : index
    %c0_18 = arith.constant 0 : index
    %24 = vector.load %arg8[%c0_17, %c0_18] : memref<8x128xbf16, #tpu.memory_space<vmem>>, vector<8x128xbf16>
    tpu.vector_store %arg8[%c0_17, %c0_18], %23 {strides = array<i32>} : memref<8x128xbf16, #tpu.memory_space<vmem>>, vector<8x128xbf16>,
    return
  }
  func.func @transform_0(%arg0: i32) -> (i32, i32) {
    %c0_i32 = arith.constant 0 : i32
    %c0_i32_0 = arith.constant 0 : i32
    return %arg0, %c0_i32 : i32, i32
  }
  func.func @transform_1(%arg0: i32) -> (i32, i32) {
    %c0_i32 = arith.constant 0 : i32
    %c0_i32_0 = arith.constant 0 : i32
    %c0_i32_1 = arith.constant 0 : i32
    return %c0_i32, %c0_i32_0 : i32, i32
  }
  func.func @transform_2(%arg0: i32) -> (i32, i32) {
    %c0_i32 = arith.constant 0 : i32
    %c0_i32_0 = arith.constant 0 : i32
    %c0_i32_1 = arith.constant 0 : i32
    return %c0_i32, %c0_i32_0 : i32, i32
  }
  func.func @transform_3(%arg0: i32) -> (i32, i32) {
    %c0_i32 = arith.constant 0 : i32
    %c0_i32_0 = arith.constant 0 : i32
    %c0_i32_1 = arith.constant 0 : i32
    return %c0_i32, %c0_i32_0 : i32, i32
  }
  func.func @transform_4(%arg0: i32) -> (i32, i32) {
    %c0_i32 = arith.constant 0 : i32
    %c0_i32_0 = arith.constant 0 : i32
    %c0_i32_1 = arith.constant 0 : i32
    return %c0_i32, %c0_i32_0 : i32, i32
  }
  func.func @transform_5(%arg0: i32) -> (i32, i32) {
    %c0_i32 = arith.constant 0 : i32
    %c0_i32_0 = arith.constant 0 : i32
    %c0_i32_1 = arith.constant 0 : i32
    return %c0_i32, %c0_i32_0 : i32, i32
  }
  func.func @transform_6(%arg0: i32) -> (i32, i32) {
    %c0_i32 = arith.constant 0 : i32
    %c0_i32_0 = arith.constant 0 : i32
    %c0_i32_1 = arith.constant 0 : i32
    return %c0_i32, %c0_i32_0 : i32, i32
  }
  func.func @transform_7(%arg0: i32) -> (i32, i32) {
    %c0_i32 = arith.constant 0 : i32
    %c0_i32_0 = arith.constant 0 : i32
    return %arg0, %c0_i32 : i32, i32
  }
}

</mosaic_0001>

<bundles_post_ra>
// kernel: func_neural_network.1
= control target key start
LH: loop header
LB: loop body
LE: loop exit
PB: predicated region body
PF: predicated region fallthrough
CT: control target
= control target key end

     0   :  { %12 = vsyncpa [#allocation3], 0  ;;  %s4144_s0 = inlined_call_operand.vmem [shape: f32[8,784], index: 0, kind: input, shape index: {}]   ;;  %s4145_s1 = inlined_call_operand.hbm [shape: bf16[784,512], index: 1, kind: input, shape index: {}]   ;;  %s4146_s2 = inlined_call_operand.vmem [shape: f32[1,512], index: 2, kind: input, shape index: {}]   ;;  %s4147_s3 = inlined_call_operand.hbm [shape: bf16[512,512], index: 3, kind: input, shape index: {}]   ;;  %s4148_s4 = inlined_call_operand.vmem [shape: f32[1,512], index: 4, kind: input, shape index: {}]   ;;  %s4149_s5 = inlined_call_operand.vmem [shape: bf16[512,128], index: 5, kind: input, shape index: {}]   ;;  %s4150_s6 = inlined_call_operand.vmem [shape: f32[1,128], index: 6, kind: input, shape index: {}]   ;;  %s4151_s7 = inlined_call_operand.vmem [shape: bf16[8,128], index: 7, kind: output, shape index: {}]  }
   0x1   :  { %13 = vsyncpa [#allocation5], 0  ;;  %s3890_s24 = smov [#allocation2]  }
   0x2   :  { %s21_s25 = sshll.u32 %s3890_s24, 4  ;;  %s22_s25 = int_to_ptr.vmem [resolvable:$true] %s21_s25 }
   0x3   :  { %s3854_s26 = scalar_lea.vmem %s22_s25, 25088  ;;  %p3859_p1 = scmp.lt.s32.totalorder %s22_s25, %s22_s25 }
   0x4   :  { %p3855_p0 = scmp.ne.s32.totalorder %s22_s25, %s3854_s26  ;;  %p3860_p2 = scmp.lt.s32.totalorder %s3854_s26, %s3854_s26 }
   0x6   :  { %p3861_p3 = por %p3860_p2, %p3859_p1 }
   0x8   :  { %p3862_p4 = pnand %p3861_p3, %p3855_p0 }
   0xa   :  { %3865 = shalt.err (!%p3862_p4)
}
   0xb   :  { %s3891_s27 = smov 256   ;;  %s3892_s28 = smov 16  }
   0xc   :  { %27 = dma.hbm_to_vmem [thread:$0]  %s4145_s1, 25088, %s22_s25, [#allocation3], %s3891_s27, %s3891_s27, %s3892_s28  }
   0xd   :  { %s3893_s8 = smov [#allocation4]  }
   0xe   :  { %s35_s9 = sshll.u32 %s3893_s8, 4  ;;  %s36_s9 = int_to_ptr.vmem [resolvable:$true] %s35_s9 }
   0xf   :  { %s3874_s10 = scalar_lea.vmem %s36_s9, 16384  ;;  %p3879_p6 = scmp.lt.s32.totalorder %s36_s9, %s36_s9 }
  0x10   :  { %p3875_p5 = scmp.ne.s32.totalorder %s36_s9, %s3874_s10  ;;  %p3880_p7 = scmp.lt.s32.totalorder %s3874_s10, %s3874_s10 }
  0x12   :  { %p3881_p8 = por %p3880_p7, %p3879_p6 }
  0x14   :  { %p3882_p9 = pnand %p3881_p8, %p3875_p5 }
  0x16   :  { %3885 = shalt.err (!%p3882_p9)
}
  0x17   :  { %41 = dma.hbm_to_vmem [thread:$0]  %s4147_s3, 16384, %s36_s9, [#allocation5], %s3891_s27, %s3891_s27, %s3892_s28  }
  0x18   :  { %3886 = dma.done.wait [#allocation3], 25088  }
  0x19   :  { %3887 = vsyncadd [#allocation3], 4294942208 }
  0x1a   :  { %3888 = dma.done.wait [#allocation5], 16384  }
  0x1b   :  { %3889 = vsyncadd [#allocation5], 4294950912  ;;  %v3328_v0 = vld [vmem:[#allocation2 + $0xe4] ss:$16 sps:$4 sm:$0xff]   ;;  %v3332_v2 = vld [vmem:[#allocation2 + $0xe0] ss:$16 sps:$4 sm:$0xff]  }
  0x1c   :  { %v3330_v1 = vld [vmem:[#allocation2 + $0x2e4] ss:$16 sps:$4 sm:$0xff]   ;;  %1271 = vmatprep.subr.bf16.mxu0 %v3328_v0  ;;  %v3333_v3 = vld [vmem:[#allocation2 + $0x2e0] ss:$16 sps:$4 sm:$0xff]   ;;  %v56_v46 = vld [vmem:[%s4144_s0 + $0x8] sm:$0xff]  ;;  %vm1267_vm0 = vcmask 130048  }
  0x1d   :  { %1312 = vmatprep.subr.bf16.mxu1 %v3330_v1  ;;  %v3334_v4 = vld [vmem:[#allocation2 + $0xc4] ss:$16 sps:$4 sm:$0xff]   ;;  %1272 = vmatpush1.bf16.msra.mxu0 %v3332_v2  ;;  %v3338_v6 = vld [vmem:[#allocation2 + $0xc0] ss:$16 sps:$4 sm:$0xff]   ;;  %v3944_v49 = vpack.c.bf16 %v56_v46, %v56_v46  ;;  %v58_v50 = vld [vmem:[%s4144_s0 + $0x18] sm:$0xff] }
  0x1e   :  { %1313 = vmatpush1.bf16.msra.mxu1 %v3333_v3  ;;  %v3336_v5 = vld [vmem:[#allocation2 + $0x2c4] ss:$16 sps:$4 sm:$0xff]   ;;  %1273 = vmatprep.subr.bf16.mxu0 %v3334_v4  ;;  %v3339_v7 = vld [vmem:[#allocation2 + $0x2c0] ss:$16 sps:$4 sm:$0xff]   ;;  %v3949_v52 = vpack.c.bf16 %v58_v50, %v58_v50 }
  0x1f   :  { %1314 = vmatprep.subr.bf16.mxu1 %v3336_v5  ;;  %v3340_v8 = vld [vmem:[#allocation2 + $0xa4] ss:$16 sps:$4 sm:$0xff]   ;;  %v3344_v10 = vld [vmem:[#allocation2 + $0xa0] ss:$16 sps:$4 sm:$0xff]   ;;  %1303 = vmatprep.mubr.bf16.mxu0 %v3944_v49 }
  0x20   :  { %v3342_v9 = vld [vmem:[#allocation2 + $0x2a4] ss:$16 sps:$4 sm:$0xff]   ;;  %v3345_v11 = vld [vmem:[#allocation2 + $0x2a0] ss:$16 sps:$4 sm:$0xff]   ;;  %1344 = vmatprep.mubr.bf16.mxu1 %v3949_v52 }
  0x21   :  { %1274 = vmatpush1.bf16.msra.mxu0 %v3338_v6  ;;  %v3346_v12 = vld [vmem:[#allocation2 + $0x84] ss:$16 sps:$4 sm:$0xff]   ;;  %v3350_v14 = vld [vmem:[#allocation2 + $0x80] ss:$16 sps:$4 sm:$0xff]  }
  0x22   :  { %1315 = vmatpush1.bf16.msra.mxu1 %v3339_v7  ;;  %1275 = vmatprep.subr.bf16.mxu0 %v3340_v8  ;;  %v3348_v13 = vld [vmem:[#allocation2 + $0x284] ss:$16 sps:$4 sm:$0xff]   ;;  %v3351_v15 = vld [vmem:[#allocation2 + $0x280] ss:$16 sps:$4 sm:$0xff]  }
  0x23   :  { %1316 = vmatprep.subr.bf16.mxu1 %v3342_v9  ;;  %v3352_v16 = vld [vmem:[#allocation2 + $0x64] ss:$16 sps:$4 sm:$0xff]   ;;  %v3356_v18 = vld [vmem:[#allocation2 + $0x60] ss:$16 sps:$4 sm:$0xff]  }
  0x24   :  { %v3354_v17 = vld [vmem:[#allocation2 + $0x264] ss:$16 sps:$4 sm:$0xff]   ;;  %v3357_v19 = vld [vmem:[#allocation2 + $0x260] ss:$16 sps:$4 sm:$0xff]  }
  0x25   :  { %1276 = vmatpush1.bf16.msra.mxu0 %v3344_v10  ;;  %v3358_v20 = vld [vmem:[#allocation2 + $0x44] ss:$16 sps:$4 sm:$0xff]   ;;  %v3362_v22 = vld [vmem:[#allocation2 + $0x40] ss:$16 sps:$4 sm:$0xff]  }
  0x26   :  { %1317 = vmatpush1.bf16.msra.mxu1 %v3345_v11  ;;  %1277 = vmatprep.subr.bf16.mxu0 %v3346_v12  ;;  %v3360_v21 = vld [vmem:[#allocation2 + $0x244] ss:$16 sps:$4 sm:$0xff]   ;;  %v3363_v23 = vld [vmem:[#allocation2 + $0x240] ss:$16 sps:$4 sm:$0xff]  }
  0x27   :  { %1318 = vmatprep.subr.bf16.mxu1 %v3348_v13  ;;  %v3364_v24 = vld [vmem:[#allocation2 + $0x24] ss:$16 sps:$4 sm:$0xff]   ;;  %v3368_v26 = vld [vmem:[#allocation2 + $0x20] ss:$16 sps:$4 sm:$0xff]   ;;  %v3435_v13 = vld [vmem:[#allocation2 + $0xec] ss:$16 sps:$4 sm:$0xff]  }
  0x28   :  { %v3366_v25 = vld [vmem:[#allocation2 + $0x224] ss:$16 sps:$4 sm:$0xff]   ;;  %v3369_v27 = vld [vmem:[#allocation2 + $0x220] ss:$16 sps:$4 sm:$0xff]  }
  0x29   :  { %1278 = vmatpush1.bf16.msra.mxu0 %v3350_v14  ;;  %v3370_v28 = vld [vmem:[#allocation2 + $0x4] ss:$16 sps:$4 sm:$0xff]   ;;  %v3374_v30 = vld [vmem:[#allocation2] ss:$16 sps:$4 sm:$0xff]  }
  0x2a   :  { %1319 = vmatpush1.bf16.msra.mxu1 %v3351_v15  ;;  %1279 = vmatprep.subr.bf16.mxu0 %v3352_v16  ;;  %v3372_v29 = vld [vmem:[#allocation2 + $0x204] ss:$16 sps:$4 sm:$0xff]   ;;  %v3375_v31 = vld [vmem:[#allocation2 + $0x200] ss:$16 sps:$4 sm:$0xff]   ;;  %v3894_v16 = vmov 0  }
  0x2b   :  { %1320 = vmatprep.subr.bf16.mxu1 %v3354_v17  ;;  %v3376_v32 = vld [vmem:[#allocation2 + $0x1e4] ss:$16 sps:$4 sm:$0xff]   ;;  %v3380_v34 = vld [vmem:[#allocation2 + $0x1e0] ss:$16 sps:$4 sm:$0xff]  }
  0x2c   :  { %v3378_v33 = vld [vmem:[#allocation2 + $0x3e4] ss:$16 sps:$4 sm:$0xff]   ;;  %v3381_v35 = vld [vmem:[#allocation2 + $0x3e0] ss:$16 sps:$4 sm:$0xff]  }
  0x2d   :  { %1280 = vmatpush1.bf16.msra.mxu0 %v3356_v18  ;;  %v3382_v36 = vld [vmem:[#allocation2 + $0x1c4] ss:$16 sps:$4 sm:$0xff]   ;;  %v3386_v38 = vld [vmem:[#allocation2 + $0x1c0] ss:$16 sps:$4 sm:$0xff]   ;;  %v3433_v18 = vld [vmem:[#allocation2 + $0xe8] ss:$16 sps:$4 sm:$0xff]  }
  0x2e   :  { %1321 = vmatpush1.bf16.msra.mxu1 %v3357_v19  ;;  %1281 = vmatprep.subr.bf16.mxu0 %v3358_v20  ;;  %v3384_v37 = vld [vmem:[#allocation2 + $0x3c4] ss:$16 sps:$4 sm:$0xff]   ;;  %v3387_v39 = vld [vmem:[#allocation2 + $0x3c0] ss:$16 sps:$4 sm:$0xff]  }
  0x2f   :  { %1322 = vmatprep.subr.bf16.mxu1 %v3360_v21  ;;  %v3388_v40 = vld [vmem:[#allocation2 + $0x1a4] ss:$16 sps:$4 sm:$0xff]   ;;  %v3392_v42 = vld [vmem:[#allocation2 + $0x1a0] ss:$16 sps:$4 sm:$0xff]   ;;  %v3441_v21 = vld [vmem:[#allocation2 + $0xcc] ss:$16 sps:$4 sm:$0xff]  }
  0x30   :  { %v3390_v41 = vld [vmem:[#allocation2 + $0x3a4] ss:$16 sps:$4 sm:$0xff]   ;;  %v3393_v43 = vld [vmem:[#allocation2 + $0x3a0] ss:$16 sps:$4 sm:$0xff]  }
  0x31   :  { %1282 = vmatpush1.bf16.msra.mxu0 %v3362_v22  ;;  %v3394_v44 = vld [vmem:[#allocation2 + $0x184] ss:$16 sps:$4 sm:$0xff]   ;;  %v3398_v47 = vld [vmem:[#allocation2 + $0x180] ss:$16 sps:$4 sm:$0xff]  }
  0x32   :  { %1323 = vmatpush1.bf16.msra.mxu1 %v3363_v23  ;;  %1283 = vmatprep.subr.bf16.mxu0 %v3364_v24  ;;  %v3396_v45 = vld [vmem:[#allocation2 + $0x384] ss:$16 sps:$4 sm:$0xff]   ;;  %v3399_v48 = vld [vmem:[#allocation2 + $0x380] ss:$16 sps:$4 sm:$0xff]   ;;  %v3439_v23 = vld [vmem:[#allocation2 + $0xc8] ss:$16 sps:$4 sm:$0xff]  }
  0x33   :  { %1324 = vmatprep.subr.bf16.mxu1 %v3366_v25  ;;  %v3400_v51 = vld [vmem:[#allocation2 + $0x164] ss:$16 sps:$4 sm:$0xff]   ;;  %v3404_v54 = vld [vmem:[#allocation2 + $0x160] ss:$16 sps:$4 sm:$0xff]   ;;  %v3447_v25 = vld [vmem:[#allocation2 + $0xac] ss:$16 sps:$4 sm:$0xff]  }
  0x34   :  { %v3402_v53 = vld [vmem:[#allocation2 + $0x364] ss:$16 sps:$4 sm:$0xff]   ;;  %v3405_v55 = vld [vmem:[#allocation2 + $0x360] ss:$16 sps:$4 sm:$0xff]  }
  0x35   :  { %1284 = vmatpush1.bf16.msra.mxu0 %v3368_v26  ;;  %v3406_v56 = vld [vmem:[#allocation2 + $0x144] ss:$16 sps:$4 sm:$0xff]   ;;  %v3410_v58 = vld [vmem:[#allocation2 + $0x140] ss:$16 sps:$4 sm:$0xff]  }
  0x36   :  { %1325 = vmatpush1.bf16.msra.mxu1 %v3369_v27  ;;  %1285 = vmatprep.subr.bf16.mxu0 %v3370_v28  ;;  %v3408_v57 = vld [vmem:[#allocation2 + $0x344] ss:$16 sps:$4 sm:$0xff]   ;;  %v3411_v59 = vld [vmem:[#allocation2 + $0x340] ss:$16 sps:$4 sm:$0xff]   ;;  %v3445_v27 = vld [vmem:[#allocation2 + $0xa8] ss:$16 sps:$4 sm:$0xff]  }
  0x37   :  { %1326 = vmatprep.subr.bf16.mxu1 %v3372_v29  ;;  %v3412_v60 = vld [vmem:[#allocation2 + $0x124] ss:$16 sps:$4 sm:$0xff]   ;;  %v3416_v62 = vld [vmem:[#allocation2 + $0x120] ss:$16 sps:$4 sm:$0xff]   ;;  %v3453_v29 = vld [vmem:[#allocation2 + $0x8c] ss:$16 sps:$4 sm:$0xff]  }
  0x38   :  { %v3414_v61 = vld [vmem:[#allocation2 + $0x324] ss:$16 sps:$4 sm:$0xff]   ;;  %v3417_v63 = vld [vmem:[#allocation2 + $0x320] ss:$16 sps:$4 sm:$0xff]  }
  0x39   :  { %1286 = vmatpush1.bf16.msra.mxu0 %v3374_v30  ;;  %v3418_v0 = vld [vmem:[#allocation2 + $0x104] ss:$16 sps:$4 sm:$0xff]   ;;  %v3422_v2 = vld [vmem:[#allocation2 + $0x100] ss:$16 sps:$4 sm:$0xff]  }
  0x3a   :  { %1327 = vmatpush1.bf16.msra.mxu1 %v3375_v31  ;;  %1287 = vmatprep.subr.bf16.mxu0 %v3376_v32  ;;  %v3420_v1 = vld [vmem:[#allocation2 + $0x304] ss:$16 sps:$4 sm:$0xff]   ;;  %v3423_v3 = vld [vmem:[#allocation2 + $0x300] ss:$16 sps:$4 sm:$0xff]   ;;  %v3451_v31 = vld [vmem:[#allocation2 + $0x88] ss:$16 sps:$4 sm:$0xff]  }
  0x3b   :  { %1328 = vmatprep.subr.bf16.mxu1 %v3378_v33  ;;  %v55_v4 = vld [vmem:[%s4144_s0] sm:$0xff]  ;;  %v57_v5 = vld [vmem:[%s4144_s0 + $0x10] sm:$0xff]  ;;  %v3459_v33 = vld [vmem:[#allocation2 + $0x6c] ss:$16 sps:$4 sm:$0xff]  }
  0x3c   :  { %v3426_v6 = vld [vmem:[#allocation2 + $0x4e4] ss:$16 sps:$4 sm:$0xff]   ;;  %v3959_v8 = vpack.c.bf16 %v55_v4, %v55_v4  ;;  %v3961_v9 = vpack.c.bf16 %v57_v5, %v57_v5  ;;  %v3424_v10 = vld [vmem:[#allocation2 + $0x4e0] ss:$16 sps:$4 sm:$0xff]   ;;  %v3507_v4 = vld [vmem:[#allocation2 + $0x16c] ss:$16 sps:$4 sm:$0xff]  }
  0x3d   :  { %1288 = vmatpush2.bf16.msra.mxu0 %v3380_v34  ;;  %v3429_v7 = vld [vmem:[#allocation2 + $0x604] ss:$16 sps:$4 sm:$0xff]   ;;  %v3427_v11 = vld [vmem:[#allocation2 + $0x600] ss:$16 sps:$4 sm:$0xff]  }
  0x3e   :  { %1329 = vmatpush2.bf16.msra.mxu1 %v3381_v35  ;;  %1289 = vmatprep.subr.bf16.mxu0 %v3382_v36  ;;  %v3432_v12 = vld [vmem:[#allocation2 + $0x4c4] ss:$16 sps:$4 sm:$0xff]   ;;  %v3430_v14 = vld [vmem:[#allocation2 + $0x4c0] ss:$16 sps:$4 sm:$0xff]   ;;  %v60_v35 = vld [vmem:[%s4144_s0 + $0x28] sm:$0xff] }
  0x3f   :  { %1330 = vmatprep.subr.bf16.mxu1 %v3384_v37  ;;  %v61_v15 = vld [vmem:[%s4144_s0 + $0x30] sm:$0xff]  ;;  %v3977_v36 = vpack.c.bf16 %v60_v35, %v60_v35  ;;  %v3457_v37 = vld [vmem:[#allocation2 + $0x68] ss:$16 sps:$4 sm:$0xff]   ;;  %v3546_v35 = vld [vmem:[#allocation2 + $0x26c] ss:$16 sps:$4 sm:$0xff]  }
  0x40   :  { %v3438_v17 = vld [vmem:[#allocation2 + $0x4a4] ss:$16 sps:$4 sm:$0xff]   ;;  %v3969_v19 = vpack.c.bf16 %v61_v15, %v61_v15  ;;  %v3436_v20 = vld [vmem:[#allocation2 + $0x4a0] ss:$16 sps:$4 sm:$0xff]  }
  0x41   :  { %1290 = vmatpush2.bf16.msra.mxu0 %v3386_v38  ;;  %v3444_v22 = vld [vmem:[#allocation2 + $0x484] ss:$16 sps:$4 sm:$0xff]   ;;  %v3442_v24 = vld [vmem:[#allocation2 + $0x480] ss:$16 sps:$4 sm:$0xff]  }
  0x42   :  { %1331 = vmatpush2.bf16.msra.mxu1 %v3387_v39  ;;  %1291 = vmatprep.subr.bf16.mxu0 %v3388_v40  ;;  %v3450_v26 = vld [vmem:[#allocation2 + $0x464] ss:$16 sps:$4 sm:$0xff]   ;;  %v3448_v28 = vld [vmem:[#allocation2 + $0x460] ss:$16 sps:$4 sm:$0xff]   ;;  %v3465_v39 = vld [vmem:[#allocation2 + $0x4c] ss:$16 sps:$4 sm:$0xff]  }
  0x43   :  { %1332 = vmatprep.subr.bf16.mxu1 %v3390_v41  ;;  %v3456_v30 = vld [vmem:[#allocation2 + $0x444] ss:$16 sps:$4 sm:$0xff]   ;;  %v3454_v32 = vld [vmem:[#allocation2 + $0x440] ss:$16 sps:$4 sm:$0xff]   ;;  %v3463_v41 = vld [vmem:[#allocation2 + $0x48] ss:$16 sps:$4 sm:$0xff]  }
  0x44   :  { %v3462_v34 = vld [vmem:[#allocation2 + $0x424] ss:$16 sps:$4 sm:$0xff]   ;;  %v3460_v38 = vld [vmem:[#allocation2 + $0x420] ss:$16 sps:$4 sm:$0xff]  }
  0x45   :  { %1292 = vmatpush2.bf16.msra.mxu0 %v3392_v42  ;;  %v3468_v40 = vld [vmem:[#allocation2 + $0x404] ss:$16 sps:$4 sm:$0xff]   ;;  %v3466_v42 = vld [vmem:[#allocation2 + $0x400] ss:$16 sps:$4 sm:$0xff]  }
  0x46   :  { %1333 = vmatpush2.bf16.msra.mxu1 %v3393_v43  ;;  %1293 = vmatprep.subr.bf16.mxu0 %v3394_v44  ;;  %v3471_v43 = vld [vmem:[#allocation2 + $0x2c] ss:$16 sps:$4 sm:$0xff]   ;;  %v3474_v44 = vld [vmem:[#allocation2 + $0x5e4] ss:$16 sps:$4 sm:$0xff]   ;;  %v3472_v46 = vld [vmem:[#allocation2 + $0x5e0] ss:$16 sps:$4 sm:$0xff]  }
  0x47   :  { %1334 = vmatprep.subr.bf16.mxu1 %v3396_v45  ;;  %v3469_v45 = vld [vmem:[#allocation2 + $0x28] ss:$16 sps:$4 sm:$0xff]   ;;  %v3478_v50 = vld [vmem:[#allocation2 + $0x5c0] ss:$16 sps:$4 sm:$0xff]   ;;  %v3510_v5 = vld [vmem:[#allocation2 + $0x524] ss:$16 sps:$4 sm:$0xff]  }
  0x48   :  { %v59_v15 = vld [vmem:[%s4144_s0 + $0x20] sm:$0xff] }
  0x49   :  { %1294 = vmatpush2.bf16.msra.mxu0 %v3398_v47  ;;  %v3477_v47 = vld [vmem:[#allocation2 + $0xc] ss:$16 sps:$4 sm:$0xff]  }
  0x4a   :  { %1335 = vmatpush2.bf16.msra.mxu1 %v3399_v48  ;;  %1295 = vmatprep.subr.bf16.mxu0 %v3400_v51  ;;  %v3480_v48 = vld [vmem:[#allocation2 + $0x5c4] ss:$16 sps:$4 sm:$0xff]   ;;  %v3483_v51 = vld [vmem:[#allocation2 + $0x1ec] ss:$16 sps:$4 sm:$0xff]  }
  0x4b   :  { %1336 = vmatprep.subr.bf16.mxu1 %v3402_v53  ;;  %v3486_v53 = vld [vmem:[#allocation2 + $0x5a4] ss:$16 sps:$4 sm:$0xff]  }
  0x4d   :  { %1296 = vmatpush2.bf16.msra.mxu0 %v3404_v54  ;;  %v3481_v54 = vld [vmem:[#allocation2 + $0x1e8] ss:$16 sps:$4 sm:$0xff]  }
  0x4e   :  { %1337 = vmatpush2.bf16.msra.mxu1 %v3405_v55  ;;  %1297 = vmatprep.subr.bf16.mxu0 %v3406_v56  ;;  %v3484_v55 = vld [vmem:[#allocation2 + $0x5a0] ss:$16 sps:$4 sm:$0xff]   ;;  %v3489_v56 = vld [vmem:[#allocation2 + $0x1cc] ss:$16 sps:$4 sm:$0xff]  }
  0x4f   :  { %1338 = vmatprep.subr.bf16.mxu1 %v3408_v57  ;;  %v3492_v57 = vld [vmem:[#allocation2 + $0x584] ss:$16 sps:$4 sm:$0xff]  }
  0x51   :  { %1298 = vmatpush2.bf16.msra.mxu0 %v3410_v58  ;;  %v3487_v58 = vld [vmem:[#allocation2 + $0x1c8] ss:$16 sps:$4 sm:$0xff]  }
  0x52   :  { %1339 = vmatpush2.bf16.msra.mxu1 %v3411_v59  ;;  %1299 = vmatprep.subr.bf16.mxu0 %v3412_v60  ;;  %v3490_v59 = vld [vmem:[#allocation2 + $0x580] ss:$16 sps:$4 sm:$0xff]   ;;  %v3495_v60 = vld [vmem:[#allocation2 + $0x1ac] ss:$16 sps:$4 sm:$0xff]  }
  0x53   :  { %1340 = vmatprep.subr.bf16.mxu1 %v3414_v61  ;;  %v3498_v61 = vld [vmem:[#allocation2 + $0x564] ss:$16 sps:$4 sm:$0xff]  }
  0x55   :  { %1300 = vmatpush2.bf16.msra.mxu0 %v3416_v62  ;;  %v3493_v62 = vld [vmem:[#allocation2 + $0x1a8] ss:$16 sps:$4 sm:$0xff]  }
  0x56   :  { %1341 = vmatpush2.bf16.msra.mxu1 %v3417_v63  ;;  %1301 = vmatprep.subr.bf16.mxu0 %v3418_v0  ;;  %v3496_v63 = vld [vmem:[#allocation2 + $0x560] ss:$16 sps:$4 sm:$0xff]   ;;  %v3501_v0 = vld [vmem:[#allocation2 + $0x18c] ss:$16 sps:$4 sm:$0xff]  }
  0x57   :  { %1342 = vmatprep.subr.bf16.mxu1 %v3420_v1  ;;  %v3504_v1 = vld [vmem:[#allocation2 + $0x544] ss:$16 sps:$4 sm:$0xff]  }
  0x59   :  { %1302 = vmatpush2.bf16.msra.mxu0 %v3422_v2  ;;  %v3499_v2 = vld [vmem:[#allocation2 + $0x188] ss:$16 sps:$4 sm:$0xff]  }
  0x5a   :  { %1343 = vmatpush2.bf16.msra.mxu1 %v3423_v3  ;;  %1353 = vmatprep.subr.bf16.mxu0 %v3426_v6  ;;  %v3502_v3 = vld [vmem:[#allocation2 + $0x540] ss:$16 sps:$4 sm:$0xff]   ;;  %v3505_v6 = vld [vmem:[#allocation2 + $0x168] ss:$16 sps:$4 sm:$0xff]  }
  0x5b   :  { %1408 = vmatprep.subr.bf16.mxu1 %v3429_v7  ;;  %v3508_v7 = vld [vmem:[#allocation2 + $0x520] ss:$16 sps:$4 sm:$0xff]  }
  0x5c   :  { %1304 = vmatmul.mubr.bf16.vlgmr.msra.gmra.mxu0 %v3959_v8 }
  0x5d   :  { %1345 = vmatmul.mubr.bf16.vlgmr.msra.gmra.mxu1 %v3961_v9  ;;  %1354 = vmatpush1.bf16.msra.mxu0 %v3424_v10  ;;  %v3513_v10 = vld [vmem:[#allocation2 + $0x14c] ss:$16 sps:$4 sm:$0xff]  }
  0x5e   :  { %1409 = vmatpush1.bf16.msra.mxu1 %v3427_v11  ;;  %1355 = vmatprep.subr.bf16.mxu0 %v3432_v12  ;;  %v3516_v11 = vld [vmem:[#allocation2 + $0x504] ss:$16 sps:$4 sm:$0xff]   ;;  %v3511_v12 = vld [vmem:[#allocation2 + $0x148] ss:$16 sps:$4 sm:$0xff]  }
  0x5f   :  { %1426 = vmatprep.mubr.bf16.mxu1 %v3894_v16  ;;  %1435 = vmatprep.subr.bf16.mxu1 %v3435_v13  ;;  %v3514_v13 = vld [vmem:[#allocation2 + $0x500] ss:$16 sps:$4 sm:$0xff]  }
  0x60   :  { %1385 = vmatprep.mubr.bf16.mxu0 %v3977_v36 }
  0x61   :  { %1356 = vmatpush1.bf16.msra.mxu0 %v3430_v14  ;;  %v3519_v14 = vld [vmem:[#allocation2 + $0x12c] ss:$16 sps:$4 sm:$0xff]  }
  0x62   :  { %1357 = vmatprep.subr.bf16.mxu0 %v3438_v17  ;;  %v3522_v17 = vld [vmem:[#allocation2 + $0x2ec] ss:$16 sps:$4 sm:$0xff]  }
  0x65   :  { %3116 = vmatmul.mubr.msk.bf16.vlgmr.msra.gmra.mxu1 %vm1267_vm0, %v3969_v19  ;;  %1358 = vmatpush1.bf16.msra.mxu0 %v3436_v20  ;;  %v3983_v20 = vpack.c.bf16 %v59_v15, %v59_v15  ;;  %v3609_v15 = vld [vmem:[#allocation2 + $0x54c] ss:$16 sps:$4 sm:$0xff]  }
  0x66   :  { %1436 = vmatpush1.bf16.msra.mxu1 %v3433_v18  ;;  %1359 = vmatprep.subr.bf16.mxu0 %v3444_v22  ;;  %v3517_v18 = vld [vmem:[#allocation2 + $0x128] ss:$16 sps:$4 sm:$0xff]   ;;  %v3525_v22 = vld [vmem:[#allocation2 + $0x10c] ss:$16 sps:$4 sm:$0xff]  }
  0x67   :  { %1437 = vmatprep.subr.bf16.mxu1 %v3441_v21  ;;  %1467 = vmatprep.mubr.bf16.mxu1 %v3944_v49  ;;  %v3475_v49 = vld [vmem:[#allocation2 + $0x8] ss:$16 sps:$4 sm:$0xff]  }
  0x68   :  { %v3520_v21 = vld [vmem:[#allocation2 + $0x2e8] ss:$16 sps:$4 sm:$0xff]  }
  0x69   :  { %1360 = vmatpush1.bf16.msra.mxu0 %v3442_v24  ;;  %v3523_v24 = vld [vmem:[#allocation2 + $0x108] ss:$16 sps:$4 sm:$0xff]  }
  0x6a   :  { %1438 = vmatpush1.bf16.msra.mxu1 %v3439_v23  ;;  %1361 = vmatprep.subr.bf16.mxu0 %v3450_v26  ;;  %v3528_v23 = vld [vmem:[#allocation2 + $0x2cc] ss:$16 sps:$4 sm:$0xff]  }
  0x6b   :  { %1439 = vmatprep.subr.bf16.mxu1 %v3447_v25  ;;  %v3526_v25 = vld [vmem:[#allocation2 + $0x2c8] ss:$16 sps:$4 sm:$0xff]   ;;  %v3531_v26 = vld [vmem:[#allocation2 + $0x4ec] ss:$16 sps:$4 sm:$0xff]  }
  0x6d   :  { %1362 = vmatpush1.bf16.msra.mxu0 %v3448_v28  ;;  %v3529_v28 = vld [vmem:[#allocation2 + $0x4e8] ss:$16 sps:$4 sm:$0xff]  }
  0x6e   :  { %1440 = vmatpush1.bf16.msra.mxu1 %v3445_v27  ;;  %1363 = vmatprep.subr.bf16.mxu0 %v3456_v30  ;;  %v3534_v27 = vld [vmem:[#allocation2 + $0x2ac] ss:$16 sps:$4 sm:$0xff]  }
  0x6f   :  { %1441 = vmatprep.subr.bf16.mxu1 %v3453_v29  ;;  %v3532_v29 = vld [vmem:[#allocation2 + $0x2a8] ss:$16 sps:$4 sm:$0xff]   ;;  %v3537_v30 = vld [vmem:[#allocation2 + $0x4cc] ss:$16 sps:$4 sm:$0xff]  }
  0x71   :  { %1364 = vmatpush1.bf16.msra.mxu0 %v3454_v32  ;;  %v3535_v32 = vld [vmem:[#allocation2 + $0x4c8] ss:$16 sps:$4 sm:$0xff]  }
  0x72   :  { %1442 = vmatpush1.bf16.msra.mxu1 %v3451_v31  ;;  %1365 = vmatprep.subr.bf16.mxu0 %v3462_v34  ;;  %v3540_v31 = vld [vmem:[#allocation2 + $0x28c] ss:$16 sps:$4 sm:$0xff]  }
  0x73   :  { %1443 = vmatprep.subr.bf16.mxu1 %v3459_v33  ;;  %v3538_v33 = vld [vmem:[#allocation2 + $0x288] ss:$16 sps:$4 sm:$0xff]   ;;  %v3543_v34 = vld [vmem:[#allocation2 + $0x4ac] ss:$16 sps:$4 sm:$0xff]  }
  0x75   :  { %1366 = vmatpush1.bf16.msra.mxu0 %v3460_v38  ;;  %v3544_v38 = vld [vmem:[#allocation2 + $0x268] ss:$16 sps:$4 sm:$0xff]  }
  0x76   :  { %1444 = vmatpush1.bf16.msra.mxu1 %v3457_v37  ;;  %1367 = vmatprep.subr.bf16.mxu0 %v3468_v40  ;;  %v3541_v37 = vld [vmem:[#allocation2 + $0x4a8] ss:$16 sps:$4 sm:$0xff]  }
  0x77   :  { %1445 = vmatprep.subr.bf16.mxu1 %v3465_v39  ;;  %v3552_v39 = vld [vmem:[#allocation2 + $0x24c] ss:$16 sps:$4 sm:$0xff]   ;;  %v3547_v40 = vld [vmem:[#allocation2 + $0x488] ss:$16 sps:$4 sm:$0xff]  }
  0x79   :  { %1368 = vmatpush1.bf16.msra.mxu0 %v3466_v42  ;;  %v3558_v42 = vld [vmem:[#allocation2 + $0x22c] ss:$16 sps:$4 sm:$0xff]  }
  0x7a   :  { %1446 = vmatpush1.bf16.msra.mxu1 %v3463_v41  ;;  %1369 = vmatprep.subr.bf16.mxu0 %v3474_v44  ;;  %v3555_v41 = vld [vmem:[#allocation2 + $0x46c] ss:$16 sps:$4 sm:$0xff]   ;;  %v3556_v44 = vld [vmem:[#allocation2 + $0x228] ss:$16 sps:$4 sm:$0xff]  }
  0x7b   :  { %1447 = vmatprep.subr.bf16.mxu1 %v3471_v43  ;;  %v3553_v43 = vld [vmem:[#allocation2 + $0x468] ss:$16 sps:$4 sm:$0xff]  }
  0x7d   :  { %1370 = vmatpush2.bf16.msra.mxu0 %v3472_v46  ;;  %v3559_v46 = vld [vmem:[#allocation2 + $0x448] ss:$16 sps:$4 sm:$0xff]  }
  0x7e   :  { %1448 = vmatpush1.bf16.msra.mxu1 %v3469_v45  ;;  %1371 = vmatprep.subr.bf16.mxu0 %v3480_v48  ;;  %v3564_v45 = vld [vmem:[#allocation2 + $0x20c] ss:$16 sps:$4 sm:$0xff]  }
  0x7f   :  { %1449 = vmatprep.subr.bf16.mxu1 %v3477_v47  ;;  %v3562_v47 = vld [vmem:[#allocation2 + $0x208] ss:$16 sps:$4 sm:$0xff]   ;;  %v3567_v48 = vld [vmem:[#allocation2 + $0x42c] ss:$16 sps:$4 sm:$0xff]  }
  0x81   :  { %1372 = vmatpush2.bf16.msra.mxu0 %v3478_v50  ;;  %v3565_v50 = vld [vmem:[#allocation2 + $0x428] ss:$16 sps:$4 sm:$0xff]  }
  0x82   :  { %1450 = vmatpush1.bf16.msra.mxu1 %v3475_v49  ;;  %1373 = vmatprep.subr.bf16.mxu0 %v3486_v53  ;;  %v3570_v49 = vld [vmem:[#allocation2 + $0x3ec] ss:$16 sps:$4 sm:$0xff]  }
  0x83   :  { %1451 = vmatprep.subr.bf16.mxu1 %v3483_v51  ;;  %v3568_v51 = vld [vmem:[#allocation2 + $0x3e8] ss:$16 sps:$4 sm:$0xff]   ;;  %v3573_v53 = vld [vmem:[#allocation2 + $0x40c] ss:$16 sps:$4 sm:$0xff]  }
  0x85   :  { %1374 = vmatpush2.bf16.msra.mxu0 %v3484_v55  ;;  %v3571_v55 = vld [vmem:[#allocation2 + $0x408] ss:$16 sps:$4 sm:$0xff]  }
  0x86   :  { %1452 = vmatpush2.bf16.msra.mxu1 %v3481_v54  ;;  %1375 = vmatprep.subr.bf16.mxu0 %v3492_v57  ;;  %v3576_v54 = vld [vmem:[#allocation2 + $0x3cc] ss:$16 sps:$4 sm:$0xff]  }
  0x87   :  { %1453 = vmatprep.subr.bf16.mxu1 %v3489_v56  ;;  %v3574_v56 = vld [vmem:[#allocation2 + $0x3c8] ss:$16 sps:$4 sm:$0xff]   ;;  %v3579_v57 = vld [vmem:[#allocation2 + $0x5ec] ss:$16 sps:$4 sm:$0xff]  }
  0x89   :  { %1376 = vmatpush2.bf16.msra.mxu0 %v3490_v59  ;;  %v3577_v59 = vld [vmem:[#allocation2 + $0x5e8] ss:$16 sps:$4 sm:$0xff]  }
  0x8a   :  { %1454 = vmatpush2.bf16.msra.mxu1 %v3487_v58  ;;  %1377 = vmatprep.subr.bf16.mxu0 %v3498_v61  ;;  %v3582_v58 = vld [vmem:[#allocation2 + $0x3ac] ss:$16 sps:$4 sm:$0xff]  }
  0x8b   :  { %1455 = vmatprep.subr.bf16.mxu1 %v3495_v60  ;;  %v3580_v60 = vld [vmem:[#allocation2 + $0x3a8] ss:$16 sps:$4 sm:$0xff]   ;;  %v3585_v61 = vld [vmem:[#allocation2 + $0x5cc] ss:$16 sps:$4 sm:$0xff]  }
  0x8d   :  { %1378 = vmatpush2.bf16.msra.mxu0 %v3496_v63  ;;  %v3583_v63 = vld [vmem:[#allocation2 + $0x5c8] ss:$16 sps:$4 sm:$0xff]  }
  0x8e   :  { %1456 = vmatpush2.bf16.msra.mxu1 %v3493_v62  ;;  %1379 = vmatprep.subr.bf16.mxu0 %v3504_v1  ;;  %v3588_v62 = vld [vmem:[#allocation2 + $0x38c] ss:$16 sps:$4 sm:$0xff]  }
  0x8f   :  { %1457 = vmatprep.subr.bf16.mxu1 %v3501_v0  ;;  %v3586_v0 = vld [vmem:[#allocation2 + $0x388] ss:$16 sps:$4 sm:$0xff]   ;;  %v3591_v1 = vld [vmem:[#allocation2 + $0x5ac] ss:$16 sps:$4 sm:$0xff]  }
  0x91   :  { %1380 = vmatpush2.bf16.msra.mxu0 %v3502_v3  ;;  %v3589_v3 = vld [vmem:[#allocation2 + $0x5a8] ss:$16 sps:$4 sm:$0xff]  }
  0x92   :  { %1458 = vmatpush2.bf16.msra.mxu1 %v3499_v2  ;;  %1381 = vmatprep.subr.bf16.mxu0 %v3510_v5  ;;  %v3594_v2 = vld [vmem:[#allocation2 + $0x36c] ss:$16 sps:$4 sm:$0xff]  }
  0x93   :  { %1459 = vmatprep.subr.bf16.mxu1 %v3507_v4  ;;  %v3592_v4 = vld [vmem:[#allocation2 + $0x368] ss:$16 sps:$4 sm:$0xff]   ;;  %v3597_v5 = vld [vmem:[#allocation2 + $0x58c] ss:$16 sps:$4 sm:$0xff]  }
  0x95   :  { %1382 = vmatpush2.bf16.msra.mxu0 %v3508_v7  ;;  %v3595_v7 = vld [vmem:[#allocation2 + $0x588] ss:$16 sps:$4 sm:$0xff]  }
  0x96   :  { %1460 = vmatpush2.bf16.msra.mxu1 %v3505_v6  ;;  %1383 = vmatprep.subr.bf16.mxu0 %v3516_v11  ;;  %v3600_v6 = vld [vmem:[#allocation2 + $0x34c] ss:$16 sps:$4 sm:$0xff]  }
  0x97   :  { %1461 = vmatprep.subr.bf16.mxu1 %v3513_v10  ;;  %v3598_v10 = vld [vmem:[#allocation2 + $0x348] ss:$16 sps:$4 sm:$0xff]   ;;  %v3603_v11 = vld [vmem:[#allocation2 + $0x56c] ss:$16 sps:$4 sm:$0xff]  }
  0x99   :  { %1384 = vmatpush2.bf16.msra.mxu0 %v3514_v13  ;;  %v3601_v13 = vld [vmem:[#allocation2 + $0x568] ss:$16 sps:$4 sm:$0xff]  }
  0x9a   :  { %1462 = vmatpush2.bf16.msra.mxu1 %v3511_v12  ;;  %1476 = vmatprep.subr.bf16.mxu0 %v3522_v17  ;;  %v3606_v12 = vld [vmem:[#allocation2 + $0x32c] ss:$16 sps:$4 sm:$0xff]  }
  0x9b   :  { %1463 = vmatprep.subr.bf16.mxu1 %v3519_v14  ;;  %v3604_v14 = vld [vmem:[#allocation2 + $0x328] ss:$16 sps:$4 sm:$0xff]   ;;  %v3612_v17 = vld [vmem:[#allocation2 + $0x30c] ss:$16 sps:$4 sm:$0xff]  }
  0x9c   :  { %1386 = vmatmul.mubr.bf16.vlgmr.msra.gmra.mxu0 %v3983_v20 }
  0x9d   :  { %1477 = vmatpush1.bf16.msra.mxu0 %v3520_v21  ;;  %1508 = vmatprep.mubr.bf16.mxu0 %v3949_v52  ;;  %v3549_v52 = vld [vmem:[#allocation2 + $0x48c] ss:$16 sps:$4 sm:$0xff]   ;;  %v3610_v21 = vld [vmem:[#allocation2 + $0x308] ss:$16 sps:$4 sm:$0xff]  }
  0x9e   :  { %1464 = vmatpush2.bf16.msra.mxu1 %v3517_v18  ;;  %1478 = vmatprep.subr.bf16.mxu0 %v3528_v23  ;;  %v3607_v18 = vld [vmem:[#allocation2 + $0x548] ss:$16 sps:$4 sm:$0xff]   ;;  %v3618_v23 = vld [vmem:[#allocation2 + $0x60c] ss:$16 sps:$4 sm:$0xff]  }
  0x9f   :  { %1465 = vmatprep.subr.bf16.mxu1 %v3525_v22  ;;  %v3615_v22 = vld [vmem:[#allocation2 + $0x52c] ss:$16 sps:$4 sm:$0xff]  }
  0xa1   :  { %1479 = vmatpush1.bf16.msra.mxu0 %v3526_v25  ;;  %v3616_v25 = vld [vmem:[#allocation2 + $0x608] ss:$16 sps:$4 sm:$0xff]  }
  0xa2   :  { %1466 = vmatpush2.bf16.msra.mxu1 %v3523_v24  ;;  %1480 = vmatprep.subr.bf16.mxu0 %v3534_v27  ;;  %v3613_v24 = vld [vmem:[#allocation2 + $0x528] ss:$16 sps:$4 sm:$0xff]   ;;  %v3624_v27 = vld [vmem:[#allocation4 + $0xe4] ss:$16 sps:$4 sm:$0xff]  }
  0xa3   :  { %1517 = vmatprep.subr.bf16.mxu1 %v3531_v26  ;;  %v3621_v26 = vld [vmem:[#allocation2 + $0x50c] ss:$16 sps:$4 sm:$0xff]  }
  0xa5   :  { %1468 = vmatmul.mubr.bf16.vlgmr.msra.gmra.mxu1 %v3959_v8  ;;  %1481 = vmatpush1.bf16.msra.mxu0 %v3532_v29  ;;  %v3550_v8 = vld [vmem:[#allocation2 + $0x248] ss:$16 sps:$4 sm:$0xff]   ;;  %v3622_v29 = vld [vmem:[#allocation4 + $0xe0] ss:$16 sps:$4 sm:$0xff]  }
  0xa6   :  { %1518 = vmatpush1.bf16.msra.mxu1 %v3529_v28  ;;  %1482 = vmatprep.subr.bf16.mxu0 %v3540_v31  ;;  %v3619_v28 = vld [vmem:[#allocation2 + $0x508] ss:$16 sps:$4 sm:$0xff]   ;;  %v3625_v31 = vld [vmem:[#allocation4 + $0xc0] ss:$16 sps:$4 sm:$0xff]  }
  0xa7   :  { %1519 = vmatprep.subr.bf16.mxu1 %v3537_v30  ;;  %1549 = vmatprep.mubr.bf16.mxu1 %v3977_v36  ;;  %v3561_v36 = vld [vmem:[#allocation2 + $0x44c] ss:$16 sps:$4 sm:$0xff]   ;;  %v3627_v30 = vld [vmem:[#allocation4 + $0xc4] ss:$16 sps:$4 sm:$0xff]  }
  0xa9   :  { %1483 = vmatpush1.bf16.msra.mxu0 %v3538_v33  ;;  %v3628_v33 = vld [vmem:[#allocation4 + $0xa0] ss:$16 sps:$4 sm:$0xff]  }
  0xaa   :  { %1520 = vmatpush1.bf16.msra.mxu1 %v3535_v32  ;;  %1484 = vmatprep.subr.bf16.mxu0 %v3546_v35  ;;  %v3630_v32 = vld [vmem:[#allocation4 + $0xa4] ss:$16 sps:$4 sm:$0xff]  }
  0xab   :  { %1521 = vmatprep.subr.bf16.mxu1 %v3543_v34  ;;  %v3631_v34 = vld [vmem:[#allocation4 + $0x80] ss:$16 sps:$4 sm:$0xff]   ;;  %v3678_v35 = vld [vmem:[#allocation4 + $0x2e4] ss:$16 sps:$4 sm:$0xff]  }
  0xad   :  { %1485 = vmatpush1.bf16.msra.mxu0 %v3544_v38  ;;  %v3682_v38 = vld [vmem:[#allocation4 + $0x2c0] ss:$16 sps:$4 sm:$0xff]  }
  0xae   :  { %1522 = vmatpush1.bf16.msra.mxu1 %v3541_v37  ;;  %1486 = vmatprep.subr.bf16.mxu0 %v3552_v39  ;;  %v3636_v37 = vld [vmem:[#allocation4 + $0x64] ss:$16 sps:$4 sm:$0xff]   ;;  %v3637_v39 = vld [vmem:[#allocation4 + $0x40] ss:$16 sps:$4 sm:$0xff]  }
  0xaf   :  { %1523 = vmatprep.subr.bf16.mxu1 %v3549_v52  ;;  %v3684_v52 = vld [vmem:[#allocation4 + $0x2c4] ss:$16 sps:$4 sm:$0xff]  }
  0xb1   :  { %1487 = vmatpush1.bf16.msra.mxu0 %v3550_v8  ;;  %v3690_v8 = vld [vmem:[#allocation4 + $0x2a4] ss:$16 sps:$4 sm:$0xff]  }
  0xb2   :  { %1524 = vmatpush1.bf16.msra.mxu1 %v3547_v40  ;;  %1488 = vmatprep.subr.bf16.mxu0 %v3558_v42  ;;  %v3688_v40 = vld [vmem:[#allocation4 + $0x2a0] ss:$16 sps:$4 sm:$0xff]  }
  0xb3   :  { %1525 = vmatprep.subr.bf16.mxu1 %v3555_v41  ;;  %v3642_v41 = vld [vmem:[#allocation4 + $0x24] ss:$16 sps:$4 sm:$0xff]   ;;  %v3640_v42 = vld [vmem:[#allocation4 + $0x20] ss:$16 sps:$4 sm:$0xff]  }
  0xb5   :  { %1489 = vmatpush1.bf16.msra.mxu0 %v3556_v44  ;;  %v3696_v44 = vld [vmem:[#allocation4 + $0x284] ss:$16 sps:$4 sm:$0xff]  }
  0xb6   :  { %1526 = vmatpush1.bf16.msra.mxu1 %v3553_v43  ;;  %1490 = vmatprep.subr.bf16.mxu0 %v3564_v45  ;;  %v3694_v43 = vld [vmem:[#allocation4 + $0x280] ss:$16 sps:$4 sm:$0xff]  }
  0xb7   :  { %1527 = vmatprep.subr.bf16.mxu1 %v3561_v36  ;;  %v3645_v36 = vld [vmem:[#allocation4 + $0x4] ss:$16 sps:$4 sm:$0xff]   ;;  %v3643_v45 = vld [vmem:[#allocation4] ss:$16 sps:$4 sm:$0xff]  }
  0xb9   :  { %1491 = vmatpush1.bf16.msra.mxu0 %v3562_v47  ;;  %v3702_v47 = vld [vmem:[#allocation4 + $0x264] ss:$16 sps:$4 sm:$0xff]  }
  0xba   :  { %1528 = vmatpush1.bf16.msra.mxu1 %v3559_v46  ;;  %1492 = vmatprep.subr.bf16.mxu0 %v3570_v49  ;;  %v3700_v46 = vld [vmem:[#allocation4 + $0x260] ss:$16 sps:$4 sm:$0xff]  }
  0xbb   :  { %1529 = vmatprep.subr.bf16.mxu1 %v3567_v48  ;;  %v3648_v48 = vld [vmem:[#allocation4 + $0x1e4] ss:$16 sps:$4 sm:$0xff]   ;;  %v3646_v49 = vld [vmem:[#allocation4 + $0x1e0] ss:$16 sps:$4 sm:$0xff]  }
  0xbd   :  { %1493 = vmatpush2.bf16.msra.mxu0 %v3568_v51  ;;  %v3708_v51 = vld [vmem:[#allocation4 + $0x244] ss:$16 sps:$4 sm:$0xff]  }
  0xbe   :  { %1530 = vmatpush1.bf16.msra.mxu1 %v3565_v50  ;;  %1494 = vmatprep.subr.bf16.mxu0 %v3576_v54  ;;  %v3706_v50 = vld [vmem:[#allocation4 + $0x240] ss:$16 sps:$4 sm:$0xff]  }
  0xbf   :  { %1531 = vmatprep.subr.bf16.mxu1 %v3573_v53  ;;  %v3651_v53 = vld [vmem:[#allocation4 + $0x1c4] ss:$16 sps:$4 sm:$0xff]   ;;  %v3649_v54 = vld [vmem:[#allocation4 + $0x1c0] ss:$16 sps:$4 sm:$0xff]  }
  0xc1   :  { %1495 = vmatpush2.bf16.msra.mxu0 %v3574_v56  ;;  %v3714_v56 = vld [vmem:[#allocation4 + $0x224] ss:$16 sps:$4 sm:$0xff]  }
  0xc2   :  { %1532 = vmatpush1.bf16.msra.mxu1 %v3571_v55  ;;  %1496 = vmatprep.subr.bf16.mxu0 %v3582_v58  ;;  %v3712_v55 = vld [vmem:[#allocation4 + $0x220] ss:$16 sps:$4 sm:$0xff]  }
  0xc3   :  { %1533 = vmatprep.subr.bf16.mxu1 %v3579_v57  ;;  %v3654_v57 = vld [vmem:[#allocation4 + $0x1a4] ss:$16 sps:$4 sm:$0xff]   ;;  %v3652_v58 = vld [vmem:[#allocation4 + $0x1a0] ss:$16 sps:$4 sm:$0xff]  }
  0xc5   :  { %1497 = vmatpush2.bf16.msra.mxu0 %v3580_v60  ;;  %v3720_v60 = vld [vmem:[#allocation4 + $0x204] ss:$16 sps:$4 sm:$0xff]  }
  0xc6   :  { %1534 = vmatpush2.bf16.msra.mxu1 %v3577_v59  ;;  %1498 = vmatprep.subr.bf16.mxu0 %v3588_v62  ;;  %v3718_v59 = vld [vmem:[#allocation4 + $0x200] ss:$16 sps:$4 sm:$0xff]  }
  0xc7   :  { %1535 = vmatprep.subr.bf16.mxu1 %v3585_v61  ;;  %v3657_v61 = vld [vmem:[#allocation4 + $0x184] ss:$16 sps:$4 sm:$0xff]   ;;  %v3655_v62 = vld [vmem:[#allocation4 + $0x180] ss:$16 sps:$4 sm:$0xff]  }
  0xc9   :  { %1499 = vmatpush2.bf16.msra.mxu0 %v3586_v0  ;;  %v3726_v0 = vld [vmem:[#allocation4 + $0x3e4] ss:$16 sps:$4 sm:$0xff]  }
  0xca   :  { %1536 = vmatpush2.bf16.msra.mxu1 %v3583_v63  ;;  %1500 = vmatprep.subr.bf16.mxu0 %v3594_v2  ;;  %v3724_v63 = vld [vmem:[#allocation4 + $0x3e0] ss:$16 sps:$4 sm:$0xff]  }
  0xcb   :  { %1537 = vmatprep.subr.bf16.mxu1 %v3591_v1  ;;  %v3660_v1 = vld [vmem:[#allocation4 + $0x164] ss:$16 sps:$4 sm:$0xff]   ;;  %v3658_v2 = vld [vmem:[#allocation4 + $0x160] ss:$16 sps:$4 sm:$0xff]  }
  0xcd   :  { %1501 = vmatpush2.bf16.msra.mxu0 %v3592_v4  ;;  %v3732_v4 = vld [vmem:[#allocation4 + $0x3c4] ss:$16 sps:$4 sm:$0xff]  }
  0xce   :  { %1538 = vmatpush2.bf16.msra.mxu1 %v3589_v3  ;;  %1502 = vmatprep.subr.bf16.mxu0 %v3600_v6  ;;  %v3730_v3 = vld [vmem:[#allocation4 + $0x3c0] ss:$16 sps:$4 sm:$0xff]  }
  0xcf   :  { %1539 = vmatprep.subr.bf16.mxu1 %v3597_v5  ;;  %v3663_v5 = vld [vmem:[#allocation4 + $0x144] ss:$16 sps:$4 sm:$0xff]   ;;  %v3661_v6 = vld [vmem:[#allocation4 + $0x140] ss:$16 sps:$4 sm:$0xff]  }
  0xd1   :  { %1503 = vmatpush2.bf16.msra.mxu0 %v3598_v10  ;;  %v3738_v10 = vld [vmem:[#allocation4 + $0x3a4] ss:$16 sps:$4 sm:$0xff]  }
  0xd2   :  { %1540 = vmatpush2.bf16.msra.mxu1 %v3595_v7  ;;  %1504 = vmatprep.subr.bf16.mxu0 %v3606_v12  ;;  %v3736_v7 = vld [vmem:[#allocation4 + $0x3a0] ss:$16 sps:$4 sm:$0xff]  }
  0xd3   :  { %1541 = vmatprep.subr.bf16.mxu1 %v3603_v11  ;;  %v3666_v11 = vld [vmem:[#allocation4 + $0x124] ss:$16 sps:$4 sm:$0xff]   ;;  %v3664_v12 = vld [vmem:[#allocation4 + $0x120] ss:$16 sps:$4 sm:$0xff]  }
  0xd5   :  { %1505 = vmatpush2.bf16.msra.mxu0 %v3604_v14  ;;  %v3744_v14 = vld [vmem:[#allocation4 + $0x384] ss:$16 sps:$4 sm:$0xff]  }
  0xd6   :  { %1542 = vmatpush2.bf16.msra.mxu1 %v3601_v13  ;;  %1506 = vmatprep.subr.bf16.mxu0 %v3612_v17  ;;  %v3742_v13 = vld [vmem:[#allocation4 + $0x380] ss:$16 sps:$4 sm:$0xff]  }
  0xd7   :  { %1543 = vmatprep.subr.bf16.mxu1 %v3609_v15  ;;  %v3669_v15 = vld [vmem:[#allocation4 + $0x104] ss:$16 sps:$4 sm:$0xff]  }
  0xd9   :  { %1507 = vmatpush2.bf16.msra.mxu0 %v3610_v21  ;;  %v3667_v21 = vld [vmem:[#allocation4 + $0x100] ss:$16 sps:$4 sm:$0xff]  }
  0xda   :  { %1544 = vmatpush2.bf16.msra.mxu1 %v3607_v18  ;;  %1572 = vmatprep.subr.bf16.mxu0 %v3618_v23 }
  0xdb   :  { %1545 = vmatprep.subr.bf16.mxu1 %v3615_v22  ;;  %v3750_v22 = vld [vmem:[#allocation4 + $0x364] ss:$16 sps:$4 sm:$0xff]  }
  0xdc   :  { %1509 = vmatmul.mubr.bf16.vlgmr.msra.gmra.mxu0 %v3961_v9  ;;  %v3633_v9 = vld [vmem:[#allocation4 + $0x84] ss:$16 sps:$4 sm:$0xff]  }
  0xdd   :  { %1573 = vmatpush1.bf16.msra.mxu0 %v3616_v25  ;;  %1590 = vmatprep.mubr.bf16.mxu0 %v3894_v16  ;;  %v3676_v16 = vld [vmem:[#allocation4 + $0x2e0] ss:$16 sps:$4 sm:$0xff]   ;;  %v3672_v25 = vld [vmem:[#allocation4 + $0xec] ss:$16 sps:$4 sm:$0xff]  }
  0xde   :  { %1546 = vmatpush2.bf16.msra.mxu1 %v3613_v24  ;;  %2397 = vmatprep.subr.bf16.mxu0 %v3624_v27 }
  0xdf   :  { %1547 = vmatprep.subr.bf16.mxu1 %v3621_v26  ;;  %v3748_v26 = vld [vmem:[#allocation4 + $0x360] ss:$16 sps:$4 sm:$0xff]  }
  0xe2   :  { %1548 = vmatpush2.bf16.msra.mxu1 %v3619_v28 }
  0xe3   :  { %2438 = vmatprep.subr.bf16.mxu1 %v3678_v35 }
  0xe4   :  { %3117 = vmatmul.mubr.msk.bf16.vlgmr.msra.gmra.mxu0 %vm1267_vm0, %v3969_v19  ;;  %v3639_v19 = vld [vmem:[#allocation4 + $0x44] ss:$16 sps:$4 sm:$0xff]  }
  0xe5   :  { %1550 = vmatmul.mubr.bf16.vlgmr.msra.gmra.mxu1 %v3983_v20  ;;  %2398 = vmatpush1.bf16.msra.mxu0 %v3622_v29  ;;  %v3634_v20 = vld [vmem:[#allocation4 + $0x60] ss:$16 sps:$4 sm:$0xff]   ;;  %v3756_v29 = vld [vmem:[#allocation4 + $0x344] ss:$16 sps:$4 sm:$0xff]  }
  0xe6   :  { %2399 = vmatprep.subr.bf16.mxu0 %v3627_v30  ;;  %2439 = vmatpush1.bf16.msra.mxu1 %v3676_v16  ;;  %v3760_v16 = vld [vmem:[#allocation4 + $0x320] ss:$16 sps:$4 sm:$0xff]  }
  0xe7   :  { %2440 = vmatprep.subr.bf16.mxu1 %v3684_v52  ;;  %v3768_v52 = vld [vmem:[#allocation4 + $0x2ec] ss:$16 sps:$4 sm:$0xff]  }
  0xe9   :  { %2400 = vmatpush1.bf16.msra.mxu0 %v3625_v31 }
  0xea   :  { %2401 = vmatprep.subr.bf16.mxu0 %v3630_v32  ;;  %2441 = vmatpush1.bf16.msra.mxu1 %v3682_v38  ;;  %v3754_v32 = vld [vmem:[#allocation4 + $0x340] ss:$16 sps:$4 sm:$0xff]  }
  0xeb   :  { %2442 = vmatprep.subr.bf16.mxu1 %v3690_v8  ;;  %v3763_v38 = vld [vmem:[#allocation4 + $0x300] ss:$16 sps:$4 sm:$0xff]  }
  0xec   :  { %v4000_v8 = vld [vmem:[%s4146_s2] sm:$0xf] }
  0xed   :  { %2402 = vmatpush1.bf16.msra.mxu0 %v3628_v33 }
  0xee   :  { %2403 = vmatprep.subr.bf16.mxu0 %v3633_v9  ;;  %2443 = vmatpush1.bf16.msra.mxu1 %v3688_v40  ;;  %v3762_v9 = vld [vmem:[#allocation4 + $0x324] ss:$16 sps:$4 sm:$0xff]  }
  0xef   :  { %2444 = vmatprep.subr.bf16.mxu1 %v3696_v44 }
  0xf1   :  { %2404 = vmatpush1.bf16.msra.mxu0 %v3631_v34 }
  0xf2   :  { %2405 = vmatprep.subr.bf16.mxu0 %v3636_v37  ;;  %2445 = vmatpush1.bf16.msra.mxu1 %v3694_v43  ;;  %v3765_v37 = vld [vmem:[#allocation4 + $0x304] ss:$16 sps:$4 sm:$0xff]  }
  0xf3   :  { %2446 = vmatprep.subr.bf16.mxu1 %v3702_v47 }
  0xf5   :  { %2406 = vmatpush1.bf16.msra.mxu0 %v3634_v20 }
  0xf6   :  { %2407 = vmatprep.subr.bf16.mxu0 %v3639_v19  ;;  %2447 = vmatpush1.bf16.msra.mxu1 %v3700_v46  ;;  %v267_v19 = vlaneseq }
  0xf7   :  { %2448 = vmatprep.subr.bf16.mxu1 %v3708_v51 }
  0xf9   :  { %2408 = vmatpush1.bf16.msra.mxu0 %v3637_v39  ;;  %v3994_v39 = vshrl.u32 %v267_v19, 7 }
  0xfa   :  { %2409 = vmatprep.subr.bf16.mxu0 %v3642_v41  ;;  %2449 = vmatpush1.bf16.msra.mxu1 %v3706_v50 }
  0xfb   :  { %2450 = vmatprep.subr.bf16.mxu1 %v3714_v56  ;;  %v269_v40 = vsub.s32 0, %v3994_v39  ;;  %v273_v41 = vsub.s32 1, %v3994_v39 }
  0xfd   :  { %2410 = vmatpush1.bf16.msra.mxu0 %v3640_v42  ;;  %v270_v42 = vrot.slane %v4000_v8, %v269_v40  ;;  %v274_v43 = vrot.slane %v4000_v8, %v273_v41 }
  0xfe   :  { %2411 = vmatprep.subr.bf16.mxu0 %v3645_v36  ;;  %2451 = vmatpush1.bf16.msra.mxu1 %v3712_v55 }
  0xff   :  { %2452 = vmatprep.subr.bf16.mxu1 %v3720_v60  ;;  %v3670_v60 = vld [vmem:[#allocation4 + $0xe8] ss:$16 sps:$4 sm:$0xff]  }
 0x101   :  { %2412 = vmatpush1.bf16.msra.mxu0 %v3643_v45 }
 0x102   :  { %2413 = vmatprep.subr.bf16.mxu0 %v3648_v48  ;;  %2453 = vmatpush1.bf16.msra.mxu1 %v3718_v59 }
 0x103   :  { %2454 = vmatprep.subr.bf16.mxu1 %v3726_v0 }
 0x105   :  { %2414 = vmatpush2.bf16.msra.mxu0 %v3646_v49 }
 0x106   :  { %2415 = vmatprep.subr.bf16.mxu0 %v3651_v53  ;;  %2455 = vmatpush2.bf16.msra.mxu1 %v3724_v63  ;;  %v3675_v63 = vld [vmem:[#allocation4 + $0xcc] ss:$16 sps:$4 sm:$0xff]  }
 0x107   :  { %2456 = vmatprep.subr.bf16.mxu1 %v3732_v4  ;;  %v3679_v4 = vld [vmem:[#allocation4 + $0xa8] ss:$16 sps:$4 sm:$0xff]  }
 0x109   :  { %2416 = vmatpush2.bf16.msra.mxu0 %v3649_v54 }
 0x10a   :  { %2417 = vmatprep.subr.bf16.mxu0 %v3654_v57  ;;  %2457 = vmatpush2.bf16.msra.mxu1 %v3730_v3  ;;  %v3681_v3 = vld [vmem:[#allocation4 + $0xac] ss:$16 sps:$4 sm:$0xff]  }
 0x10b   :  { %2458 = vmatprep.subr.bf16.mxu1 %v3738_v10  ;;  %v3691_v10 = vld [vmem:[#allocation4 + $0x68] ss:$16 sps:$4 sm:$0xff]  }
 0x10d   :  { %2418 = vmatpush2.bf16.msra.mxu0 %v3652_v58 }
 0x10e   :  { %2419 = vmatprep.subr.bf16.mxu0 %v3657_v61  ;;  %2459 = vmatpush2.bf16.msra.mxu1 %v3736_v7  ;;  %v3693_v7 = vld [vmem:[#allocation4 + $0x6c] ss:$16 sps:$4 sm:$0xff]  }
 0x10f   :  { %2460 = vmatprep.subr.bf16.mxu1 %v3744_v14  ;;  %v3703_v14 = vld [vmem:[#allocation4 + $0x28] ss:$16 sps:$4 sm:$0xff]  }
 0x111   :  { %2420 = vmatpush2.bf16.msra.mxu0 %v3655_v62 }
 0x112   :  { %2421 = vmatprep.subr.bf16.mxu0 %v3660_v1  ;;  %2461 = vmatpush2.bf16.msra.mxu1 %v3742_v13  ;;  %v3673_v1 = vld [vmem:[#allocation4 + $0xc8] ss:$16 sps:$4 sm:$0xff]   ;;  %v3705_v13 = vld [vmem:[#allocation4 + $0x2c] ss:$16 sps:$4 sm:$0xff]  }
 0x113   :  { %2462 = vmatprep.subr.bf16.mxu1 %v3750_v22  ;;  %v3723_v22 = vld [vmem:[#allocation4 + $0x1cc] ss:$16 sps:$4 sm:$0xff]  }
 0x115   :  { %2422 = vmatpush2.bf16.msra.mxu0 %v3658_v2 }
 0x116   :  { %2423 = vmatprep.subr.bf16.mxu0 %v3663_v5  ;;  %2463 = vmatpush2.bf16.msra.mxu1 %v3748_v26  ;;  %v3687_v5 = vld [vmem:[#allocation4 + $0x8c] ss:$16 sps:$4 sm:$0xff]  }
 0x117   :  { %2464 = vmatprep.subr.bf16.mxu1 %v3756_v29  ;;  %v3735_v26 = vld [vmem:[#allocation4 + $0x18c] ss:$16 sps:$4 sm:$0xff]   ;;  %v3739_v29 = vld [vmem:[#allocation4 + $0x168] ss:$16 sps:$4 sm:$0xff]  }
 0x119   :  { %2424 = vmatpush2.bf16.msra.mxu0 %v3661_v6  ;;  %v3685_v6 = vld [vmem:[#allocation4 + $0x88] ss:$16 sps:$4 sm:$0xff]  }
 0x11a   :  { %2425 = vmatprep.subr.bf16.mxu0 %v3666_v11  ;;  %2465 = vmatpush2.bf16.msra.mxu1 %v3754_v32  ;;  %v3699_v11 = vld [vmem:[#allocation4 + $0x4c] ss:$16 sps:$4 sm:$0xff]   ;;  %v3745_v32 = vld [vmem:[#allocation4 + $0x148] ss:$16 sps:$4 sm:$0xff]  }
 0x11b   :  { %2466 = vmatprep.subr.bf16.mxu1 %v3762_v9  ;;  %v281_v9 = vsub.s32 3, %v3994_v39 }
 0x11c   :  { %v1305_v17 = vpop.f32.mrf.mxu0 }
 0x11d   :  { %v1346_v18 = vpop.f32.mrf.mxu1  ;;  %2426 = vmatpush2.bf16.msra.mxu0 %v3664_v12  ;;  %v1306_v44 = vadd.f32 %v1305_v17, %v270_v42  ;;  %v3697_v12 = vld [vmem:[#allocation4 + $0x48] ss:$16 sps:$4 sm:$0xff]  }
 0x11e   :  { %v1307_v23 = vpop.f32.mrf.mxu0  ;;  %2427 = vmatprep.subr.bf16.mxu0 %v3669_v15  ;;  %2467 = vmatpush2.bf16.msra.mxu1 %v3760_v16  ;;  %v3711_v15 = vld [vmem:[#allocation4 + $0xc] ss:$16 sps:$4 sm:$0xff]   ;;  %v3709_v17 = vld [vmem:[#allocation4 + $0x8] ss:$16 sps:$4 sm:$0xff]  }
 0x11f   :  { %v1348_v24 = vpop.f32.mrf.mxu1  ;;  %2468 = vmatprep.subr.bf16.mxu1 %v3765_v37  ;;  %v1308_v36 = vadd.f32 %v1307_v23, %v274_v43  ;;  %v1347_v45 = vadd.f32 %v1346_v18, %v1306_v44  ;;  %v3717_v18 = vld [vmem:[#allocation4 + $0x1ec] ss:$16 sps:$4 sm:$0xff]   ;;  %v3721_v23 = vld [vmem:[#allocation4 + $0x1c8] ss:$16 sps:$4 sm:$0xff]  }
 0x120   :  { %v1309_v27 = vpop.f32.mrf.mxu0  ;;  %v3757_v42 = vld [vmem:[#allocation4 + $0x108] ss:$16 sps:$4 sm:$0xff]  }
 0x121   :  { %v1350_v28 = vpop.f32.mrf.mxu1  ;;  %2428 = vmatpush2.bf16.msra.mxu0 %v3667_v21  ;;  %v1349_v47 = vadd.f32 %v1348_v24, %v1308_v36  ;;  %v3715_v21 = vld [vmem:[#allocation4 + $0x1e8] ss:$16 sps:$4 sm:$0xff]   ;;  %v3729_v24 = vld [vmem:[#allocation4 + $0x1ac] ss:$16 sps:$4 sm:$0xff]  }
 0x122   :  { %v1310_v30 = vpop.f32.mrf.mxu0  ;;  %2479 = vmatprep.subr.bf16.mxu0 %v3672_v25  ;;  %2469 = vmatpush2.bf16.msra.mxu1 %v3763_v38  ;;  %v3727_v25 = vld [vmem:[#allocation4 + $0x1a8] ss:$16 sps:$4 sm:$0xff]   ;;  %v3741_v28 = vld [vmem:[#allocation4 + $0x16c] ss:$16 sps:$4 sm:$0xff]   ;;  %v282_v38 = vrot.slane %v4000_v8, %v281_v9 }
 0x123   :  { %v1351_v31 = vpop.f32.mrf.mxu1  ;;  %2520 = vmatprep.subr.bf16.mxu1 %v3768_v52  ;;  %v3733_v27 = vld [vmem:[#allocation4 + $0x188] ss:$16 sps:$4 sm:$0xff]   ;;  %v3747_v30 = vld [vmem:[#allocation4 + $0x14c] ss:$16 sps:$4 sm:$0xff]  }
 0x124   :  { %v277_v31 = vsub.s32 2, %v3994_v39 }
 0x125   :  { %v1428_v33 = vpop.f32.mrf.mxu1 }
 0x126   :  { %v278_v16 = vrot.slane %v4000_v8, %v277_v31 }
 0x127   :  { %v1430_v34 = vpop.f32.mrf.mxu1 }
 0x129   :  { %v1432_v35 = vpop.f32.mrf.mxu1 }
 0x12a   :  { %v3751_v35 = vld [vmem:[#allocation4 + $0x128] ss:$16 sps:$4 sm:$0xff]  }
 0x12b   :  { %v1433_v20 = vpop.f32.mrf.mxu1 }
 0x12c   :  { %v3759_v20 = vld [vmem:[#allocation4 + $0x10c] ss:$16 sps:$4 sm:$0xff]  }
 0x15c   :  { %v1387_v46 = vpop.f32.mrf.mxu0 }
 0x15d   :  { %v1388_v48 = vadd.f32 %v1387_v46, %v1347_v45 }
 0x15e   :  { %v1389_v49 = vpop.f32.mrf.mxu0 }
 0x15f   :  { %v1429_v50 = vadd.f32 %v1428_v33, %v1388_v48  ;;  %v1390_v51 = vadd.f32 %v1389_v49, %v1349_v47  ;;  %v3753_v33 = vld [vmem:[#allocation4 + $0x12c] ss:$16 sps:$4 sm:$0xff]  }
 0x160   :  { %v1391_v53 = vpop.f32.mrf.mxu0 }
 0x161   :  { %v1431_v54 = vadd.f32 %v1430_v34, %v1390_v51  ;;  %v1599_v55 = vmax.f32 %v1429_v50, 0.0 }
 0x162   :  { %v1392_v56 = vpop.f32.mrf.mxu0 }
 0x163   :  { %v1600_v57 = vmax.f32 %v1431_v54, 0.0  ;;  %v4011_v61 = vpack.c.bf16 %v1599_v55, %v1599_v55 }
 0x165   :  { %v4009_v58 = vpop.f32.mrf.mxu1  ;;  %v1604_v59 = vpack.c.bf16 %v1600_v57, %v1600_v57 }
 0x166   :  { %v1470_v19 = vadd.f32 %v4009_v58, %v278_v16  ;;  %v3804_v16 = vld [vmem:[#allocation4 + $0x36c] ss:$16 sps:$4 sm:$0xff]  }
 0x167   :  { %v4013_v62 = vpop.f32.mrf.mxu1  ;;  %2429 = vmatprep.mubr.bf16.mxu0 %v1604_v59 }
 0x168   :  { %2430 = vmatmul.mubr.bf16.vlgmr.msra.gmra.mxu0 %v4011_v61  ;;  %v1472_v44 = vadd.f32 %v4013_v62, %v282_v38  ;;  %v3766_v62 = vld [vmem:[#allocation4 + $0x2e8] ss:$16 sps:$4 sm:$0xff]   ;;  %v3810_v38 = vld [vmem:[#allocation4 + $0x32c] ss:$16 sps:$4 sm:$0xff]  }
 0x169   :  { %v1473_v0 = vpop.f32.mrf.mxu1  ;;  %2480 = vmatpush1.bf16.msra.mxu0 %v3670_v60  ;;  %2511 = vmatprep.mubr.bf16.mxu0 %v1604_v59 }
 0x16a   :  { %2481 = vmatprep.subr.bf16.mxu0 %v3675_v63  ;;  %v3771_v0 = vld [vmem:[#allocation4 + $0x2cc] ss:$16 sps:$4 sm:$0xff]  }
 0x16b   :  { %v1474_v2 = vpop.f32.mrf.mxu1 }
 0x16c   :  { %v3815_v2 = vld [vmem:[%s4149_s5 + $0x38] sm:$0xff]  }
 0x16d   :  { %2482 = vmatpush1.bf16.msra.mxu0 %v3673_v1  ;;  %v3814_v1 = vld [vmem:[%s4149_s5 + $0x78] sm:$0xff]  }
 0x16e   :  { %2483 = vmatprep.subr.bf16.mxu0 %v3681_v3  ;;  %v3769_v3 = vld [vmem:[#allocation4 + $0x2c8] ss:$16 sps:$4 sm:$0xff]  }
 0x171   :  { %2484 = vmatpush1.bf16.msra.mxu0 %v3679_v4  ;;  %v3774_v4 = vld [vmem:[#allocation4 + $0x2ac] ss:$16 sps:$4 sm:$0xff]  }
 0x172   :  { %2485 = vmatprep.subr.bf16.mxu0 %v3687_v5  ;;  %v3817_v5 = vld [vmem:[%s4149_s5 + $0x30] sm:$0xff]  }
 0x175   :  { %2486 = vmatpush1.bf16.msra.mxu0 %v3685_v6  ;;  %v3818_v6 = vld [vmem:[%s4149_s5 + $0x68] sm:$0xff]  }
 0x176   :  { %2487 = vmatprep.subr.bf16.mxu0 %v3693_v7  ;;  %v3772_v7 = vld [vmem:[#allocation4 + $0x2a8] ss:$16 sps:$4 sm:$0xff]  }
 0x179   :  { %2488 = vmatpush1.bf16.msra.mxu0 %v3691_v10  ;;  %v3777_v10 = vld [vmem:[#allocation4 + $0x28c] ss:$16 sps:$4 sm:$0xff]  }
 0x17a   :  { %2489 = vmatprep.subr.bf16.mxu0 %v3699_v11  ;;  %v3819_v11 = vld [vmem:[%s4149_s5 + $0x28] sm:$0xff]  }
 0x17d   :  { %2490 = vmatpush1.bf16.msra.mxu0 %v3697_v12  ;;  %v3820_v12 = vld [vmem:[%s4149_s5 + $0x60] sm:$0xff]  }
 0x17e   :  { %2491 = vmatprep.subr.bf16.mxu0 %v3705_v13  ;;  %v3775_v13 = vld [vmem:[#allocation4 + $0x288] ss:$16 sps:$4 sm:$0xff]  }
 0x181   :  { %2492 = vmatpush1.bf16.msra.mxu0 %v3703_v14  ;;  %v3780_v14 = vld [vmem:[#allocation4 + $0x26c] ss:$16 sps:$4 sm:$0xff]  }
 0x182   :  { %2493 = vmatprep.subr.bf16.mxu0 %v3711_v15  ;;  %v3821_v15 = vld [vmem:[%s4149_s5 + $0x20] sm:$0xff]  }
 0x185   :  { %2494 = vmatpush1.bf16.msra.mxu0 %v3709_v17  ;;  %v3778_v17 = vld [vmem:[#allocation4 + $0x268] ss:$16 sps:$4 sm:$0xff]  }
 0x186   :  { %2495 = vmatprep.subr.bf16.mxu0 %v3717_v18  ;;  %v3783_v18 = vld [vmem:[#allocation4 + $0x24c] ss:$16 sps:$4 sm:$0xff]  }
 0x189   :  { %2496 = vmatpush2.bf16.msra.mxu0 %v3715_v21  ;;  %v3781_v21 = vld [vmem:[#allocation4 + $0x248] ss:$16 sps:$4 sm:$0xff]  }
 0x18a   :  { %2497 = vmatprep.subr.bf16.mxu0 %v3723_v22  ;;  %v3786_v22 = vld [vmem:[#allocation4 + $0x22c] ss:$16 sps:$4 sm:$0xff]  }
 0x18d   :  { %2498 = vmatpush2.bf16.msra.mxu0 %v3721_v23  ;;  %v3784_v23 = vld [vmem:[#allocation4 + $0x228] ss:$16 sps:$4 sm:$0xff]  }
 0x18e   :  { %2499 = vmatprep.subr.bf16.mxu0 %v3729_v24  ;;  %v3789_v24 = vld [vmem:[#allocation4 + $0x20c] ss:$16 sps:$4 sm:$0xff]  }
 0x191   :  { %2500 = vmatpush2.bf16.msra.mxu0 %v3727_v25  ;;  %v3787_v25 = vld [vmem:[#allocation4 + $0x208] ss:$16 sps:$4 sm:$0xff]  }
 0x192   :  { %2501 = vmatprep.subr.bf16.mxu0 %v3735_v26  ;;  %v3792_v26 = vld [vmem:[#allocation4 + $0x3ec] ss:$16 sps:$4 sm:$0xff]  }
 0x195   :  { %2502 = vmatpush2.bf16.msra.mxu0 %v3733_v27  ;;  %v3790_v27 = vld [vmem:[#allocation4 + $0x3e8] ss:$16 sps:$4 sm:$0xff]  }
 0x196   :  { %2503 = vmatprep.subr.bf16.mxu0 %v3741_v28  ;;  %v3795_v28 = vld [vmem:[#allocation4 + $0x3cc] ss:$16 sps:$4 sm:$0xff]  }
 0x199   :  { %2504 = vmatpush2.bf16.msra.mxu0 %v3739_v29  ;;  %v3793_v29 = vld [vmem:[#allocation4 + $0x3c8] ss:$16 sps:$4 sm:$0xff]  }
 0x19a   :  { %2505 = vmatprep.subr.bf16.mxu0 %v3747_v30  ;;  %v3798_v30 = vld [vmem:[#allocation4 + $0x3ac] ss:$16 sps:$4 sm:$0xff]  }
 0x19c   :  { %v1510_v34 = vpop.f32.mrf.mxu0 }
 0x19d   :  { %2506 = vmatpush2.bf16.msra.mxu0 %v3745_v32  ;;  %v1511_v36 = vadd.f32 %v1510_v34, %v1470_v19  ;;  %v3796_v32 = vld [vmem:[#allocation4 + $0x3a8] ss:$16 sps:$4 sm:$0xff]   ;;  %v3813_v19 = vld [vmem:[#allocation4 + $0x30c] ss:$16 sps:$4 sm:$0xff]  }
 0x19e   :  { %v1512_v37 = vpop.f32.mrf.mxu0  ;;  %2507 = vmatprep.subr.bf16.mxu0 %v3753_v33  ;;  %v3801_v33 = vld [vmem:[#allocation4 + $0x38c] ss:$16 sps:$4 sm:$0xff]   ;;  %v3799_v34 = vld [vmem:[#allocation4 + $0x388] ss:$16 sps:$4 sm:$0xff]  }
 0x19f   :  { %v1513_v47 = vadd.f32 %v1512_v37, %v1472_v44  ;;  %v3807_v37 = vld [vmem:[#allocation4 + $0x34c] ss:$16 sps:$4 sm:$0xff]  }
 0x1a0   :  { %v1514_v52 = vpop.f32.mrf.mxu0  ;;  %v3823_v44 = vld [vmem:[%s4149_s5 + $0x18] sm:$0xff]  }
 0x1a1   :  { %2508 = vmatpush2.bf16.msra.mxu0 %v3751_v35  ;;  %v3802_v35 = vld [vmem:[#allocation4 + $0x368] ss:$16 sps:$4 sm:$0xff]  }
 0x1a2   :  { %v1515_v43 = vpop.f32.mrf.mxu0  ;;  %2509 = vmatprep.subr.bf16.mxu0 %v3759_v20  ;;  %v3805_v20 = vld [vmem:[#allocation4 + $0x348] ss:$16 sps:$4 sm:$0xff]  }
 0x1a3   :  { %v3808_v52 = vld [vmem:[#allocation4 + $0x328] ss:$16 sps:$4 sm:$0xff]  }
 0x1a4   :  { %v1592_v46 = vpop.f32.mrf.mxu0  ;;  %v3822_v43 = vld [vmem:[%s4149_s5 + $0x58] sm:$0xff]  }
 0x1a5   :  { %v1551_v45 = vpop.f32.mrf.mxu1  ;;  %2510 = vmatpush2.bf16.msra.mxu0 %v3757_v42  ;;  %v3811_v42 = vld [vmem:[#allocation4 + $0x308] ss:$16 sps:$4 sm:$0xff]  }
 0x1a6   :  { %v1552_v48 = vadd.f32 %v1551_v45, %v1511_v36  ;;  %v1594_v50 = vpop.f32.mrf.mxu0  ;;  %3279 = vmatprep.subr.bf16.mxu0 %v3814_v1  ;;  %v3824_v36 = vld [vmem:[%s4149_s5 + $0x50] sm:$0xff]  }
 0x1a7   :  { %v1553_v49 = vpop.f32.mrf.mxu1  ;;  %v3825_v45 = vld [vmem:[%s4149_s5 + $0x10] sm:$0xff]  }
 0x1a8   :  { %v1593_v51 = vadd.f32 %v1592_v46, %v1552_v48  ;;  %v1554_v53 = vadd.f32 %v1553_v49, %v1513_v47  ;;  %2512 = vmatmul.mubr.bf16.vlgmr.msra.gmra.mxu0 %v4011_v61  ;;  %v1596_v54 = vpop.f32.mrf.mxu0  ;;  %v3816_v61 = vld [vmem:[%s4149_s5 + $0x70] sm:$0xff]   ;;  %v3826_v46 = vld [vmem:[%s4149_s5 + $0x48] sm:$0xff]   ;;  %v3828_v48 = vld [vmem:[%s4149_s5 + $0x40] sm:$0xff]  }
 0x1a9   :  { %v1555_v8 = vpop.f32.mrf.mxu1  ;;  %3280 = vmatpush3.bf16.msra.mxu0 %v3815_v2  ;;  %v3827_v47 = vld [vmem:[%s4149_s5 + $0x8] sm:$0xff]   ;;  %v3829_v49 = vld [vmem:[%s4149_s5] sm:$0xff]  }
 0x1aa   :  { %v1595_v55 = vadd.f32 %v1594_v50, %v1554_v53  ;;  %v1601_v56 = vmax.f32 %v1593_v51, 0.0  ;;  %v1597_v58 = vpop.f32.mrf.mxu0  ;;  %3281 = vmatprep.subr.bf16.mxu0 %v3816_v61  ;;  %v3830_v50 = vld [vmem:[%s4149_s5 + $0xf8] sm:$0xff]   ;;  %v3832_v53 = vld [vmem:[%s4149_s5 + $0xf0] sm:$0xff]   ;;  %v3834_v54 = vld [vmem:[%s4149_s5 + $0xe8] sm:$0xff]  }
 0x1ab   :  { %v1556_v57 = vpop.f32.mrf.mxu1  ;;  %v3831_v51 = vld [vmem:[%s4149_s5 + $0xb8] sm:$0xff]   ;;  %v3833_v8 = vld [vmem:[%s4149_s5 + $0xb0] sm:$0xff]   ;;  %v3842_v61 = vld [vmem:[%s4149_s5 + $0xc8] sm:$0xff]  }
 0x1ac   :  { %v1602_v59 = vmax.f32 %v1595_v55, 0.0  ;;  %v4027_v63 = vpack.c.bf16 %v1601_v56, %v1601_v56  ;;  %v3835_v55 = vld [vmem:[%s4149_s5 + $0xa8] sm:$0xff]   ;;  %v3836_v56 = vld [vmem:[%s4149_s5 + $0xe0] sm:$0xff]   ;;  %v3838_v58 = vld [vmem:[%s4149_s5 + $0xd8] sm:$0xff]  }
 0x1ad   :  { %3282 = vmatpush3.bf16.msra.mxu0 %v3817_v5  ;;  %v3837_v57 = vld [vmem:[%s4149_s5 + $0xa0] sm:$0xff]  }
 0x1ae   :  { %v1606_v60 = vpack.c.bf16 %v1602_v59, %v1602_v59  ;;  %3283 = vmatprep.subr.bf16.mxu0 %v3818_v6  ;;  %v3839_v59 = vld [vmem:[%s4149_s5 + $0x98] sm:$0xff]   ;;  %v3845_v5 = vld [vmem:[%s4149_s5 + $0x80] sm:$0xff]  }
 0x1af   :  { %v1735_v6 = vld [vmem:[%s4148_s4] sm:$0xf] }
 0x1b0   :  { %2470 = vmatprep.mubr.bf16.mxu1 %v1606_v60 }
 0x1b1   :  { %2471 = vmatmul.mubr.bf16.vlgmr.msra.gmra.mxu1 %v4027_v63  ;;  %3284 = vmatpush3.bf16.msra.mxu0 %v3819_v11  ;;  %v1740_v11 = vrot.slane %v1735_v6, %v269_v40  ;;  %v1748_v40 = vrot.slane %v1735_v6, %v277_v31 }
 0x1b2   :  { %2521 = vmatpush1.bf16.msra.mxu1 %v3766_v62  ;;  %2552 = vmatprep.mubr.bf16.mxu1 %v1606_v60  ;;  %v3840_v60 = vld [vmem:[%s4149_s5 + $0xd0] sm:$0xff]  }
 0x1b3   :  { %2522 = vmatprep.subr.bf16.mxu1 %v3771_v0  ;;  %3285 = vmatprep.subr.bf16.mxu0 %v3820_v12  ;;  %v3841_v62 = vld [vmem:[%s4149_s5 + $0x90] sm:$0xff]  }
 0x1b5   :  { %3286 = vmatpush3.bf16.msra.mxu0 %v3821_v15 }
 0x1b6   :  { %2523 = vmatpush1.bf16.msra.mxu1 %v3769_v3  ;;  %3287 = vmatprep.subr.bf16.mxu0 %v3822_v43  ;;  %v3843_v3 = vld [vmem:[%s4149_s5 + $0x88] sm:$0xff]  }
 0x1b7   :  { %2524 = vmatprep.subr.bf16.mxu1 %v3774_v4  ;;  %v3844_v4 = vld [vmem:[%s4149_s5 + $0xc0] sm:$0xff]  }
 0x1b9   :  { %3288 = vmatpush3.bf16.msra.mxu0 %v3823_v44 }
 0x1ba   :  { %2525 = vmatpush1.bf16.msra.mxu1 %v3772_v7  ;;  %3289 = vmatprep.subr.bf16.mxu0 %v3824_v36 }
 0x1bb   :  { %2526 = vmatprep.subr.bf16.mxu1 %v3777_v10 }
 0x1bd   :  { %3290 = vmatpush3.bf16.msra.mxu0 %v3825_v45 }
 0x1be   :  { %2527 = vmatpush1.bf16.msra.mxu1 %v3775_v13  ;;  %3291 = vmatprep.subr.bf16.mxu0 %v3826_v46  ;;  %v1744_v13 = vrot.slane %v1735_v6, %v273_v41  ;;  %v1752_v41 = vrot.slane %v1735_v6, %v281_v9  ;;  %v3246_v9 = vld [vmem:[%s4150_s6] ss:$0 sm:$0xff] }
 0x1bf   :  { %2528 = vmatprep.subr.bf16.mxu1 %v3780_v14 }
 0x1c1   :  { %3292 = vmatpush3.bf16.msra.mxu0 %v3827_v47 }
 0x1c2   :  { %2529 = vmatpush1.bf16.msra.mxu1 %v3778_v17  ;;  %3293 = vmatprep.subr.bf16.mxu0 %v3828_v48 }
 0x1c3   :  { %2530 = vmatprep.subr.bf16.mxu1 %v3783_v18 }
 0x1c5   :  { %3294 = vmatpush3.bf16.msra.mxu0 %v3829_v49 }
 0x1c6   :  { %2531 = vmatpush1.bf16.msra.mxu1 %v3781_v21 }
 0x1c7   :  { %2532 = vmatprep.subr.bf16.mxu1 %v3786_v22 }
 0x1ca   :  { %2533 = vmatpush1.bf16.msra.mxu1 %v3784_v23 }
 0x1cb   :  { %2534 = vmatprep.subr.bf16.mxu1 %v3789_v24 }
 0x1ce   :  { %2535 = vmatpush1.bf16.msra.mxu1 %v3787_v25 }
 0x1cf   :  { %2536 = vmatprep.subr.bf16.mxu1 %v3792_v26 }
 0x1d2   :  { %2537 = vmatpush2.bf16.msra.mxu1 %v3790_v27 }
 0x1d3   :  { %2538 = vmatprep.subr.bf16.mxu1 %v3795_v28 }
 0x1d6   :  { %2539 = vmatpush2.bf16.msra.mxu1 %v3793_v29 }
 0x1d7   :  { %2540 = vmatprep.subr.bf16.mxu1 %v3798_v30 }
 0x1da   :  { %2541 = vmatpush2.bf16.msra.mxu1 %v3796_v32 }
 0x1db   :  { %2542 = vmatprep.subr.bf16.mxu1 %v3801_v33 }
 0x1de   :  { %2543 = vmatpush2.bf16.msra.mxu1 %v3799_v34 }
 0x1df   :  { %2544 = vmatprep.subr.bf16.mxu1 %v3804_v16 }
 0x1e2   :  { %2545 = vmatpush2.bf16.msra.mxu1 %v3802_v35 }
 0x1e3   :  { %2546 = vmatprep.subr.bf16.mxu1 %v3807_v37 }
 0x1e6   :  { %2547 = vmatpush2.bf16.msra.mxu1 %v3805_v20 }
 0x1e7   :  { %2548 = vmatprep.subr.bf16.mxu1 %v3810_v38 }
 0x1ea   :  { %2549 = vmatpush2.bf16.msra.mxu1 %v3808_v52 }
 0x1eb   :  { %2550 = vmatprep.subr.bf16.mxu1 %v3813_v19 }
 0x1ee   :  { %2551 = vmatpush2.bf16.msra.mxu1 %v3811_v42 }
 0x1ef   :  { %3301 = vmatprep.subr.bf16.mxu1 %v3830_v50 }
 0x1f1   :  { %2553 = vmatmul.mubr.bf16.vlgmr.msra.gmra.mxu1 %v4027_v63 }
 0x1f2   :  { %3302 = vmatpush3.bf16.msra.mxu1 %v3831_v51 }
 0x1f3   :  { %3303 = vmatprep.subr.bf16.mxu1 %v3832_v53 }
 0x1f6   :  { %3304 = vmatpush3.bf16.msra.mxu1 %v3833_v8 }
 0x1f7   :  { %3305 = vmatprep.subr.bf16.mxu1 %v3834_v54 }
 0x1fa   :  { %3306 = vmatpush3.bf16.msra.mxu1 %v3835_v55 }
 0x1fb   :  { %3307 = vmatprep.subr.bf16.mxu1 %v3836_v56 }
 0x1fe   :  { %3308 = vmatpush3.bf16.msra.mxu1 %v3837_v57 }
 0x1ff   :  { %3309 = vmatprep.subr.bf16.mxu1 %v3838_v58 }
 0x202   :  { %3310 = vmatpush3.bf16.msra.mxu1 %v3839_v59 }
 0x203   :  { %3311 = vmatprep.subr.bf16.mxu1 %v3840_v60 }
 0x206   :  { %3312 = vmatpush3.bf16.msra.mxu1 %v3841_v62 }
 0x207   :  { %3313 = vmatprep.subr.bf16.mxu1 %v3842_v61 }
 0x20a   :  { %3314 = vmatpush3.bf16.msra.mxu1 %v3843_v3 }
 0x20b   :  { %3315 = vmatprep.subr.bf16.mxu1 %v3844_v4 }
 0x20e   :  { %3316 = vmatpush3.bf16.msra.mxu1 %v3845_v5 }
 0x228   :  { %v2431_v63 = vpop.f32.mrf.mxu0 }
 0x229   :  { %v2432_v15 = vadd.f32 %v2431_v63, %v1740_v11 }
 0x22a   :  { %v2433_v0 = vpop.f32.mrf.mxu0 }
 0x22b   :  { %v2434_v18 = vadd.f32 %v2433_v0, %v1744_v13 }
 0x22c   :  { %v2435_v1 = vpop.f32.mrf.mxu0 }
 0x22e   :  { %v2436_v2 = vpop.f32.mrf.mxu0 }
 0x268   :  { %v2513_v7 = vpop.f32.mrf.mxu0 }
 0x269   :  { %v2514_v30 = vadd.f32 %v2513_v7, %v1748_v40 }
 0x26a   :  { %v2515_v10 = vpop.f32.mrf.mxu0 }
 0x26b   :  { %v2516_v33 = vadd.f32 %v2515_v10, %v1752_v41 }
 0x26c   :  { %v2517_v12 = vpop.f32.mrf.mxu0 }
 0x26e   :  { %v2518_v14 = vpop.f32.mrf.mxu0 }
 0x271   :  { %v2472_v17 = vpop.f32.mrf.mxu1 }
 0x272   :  { %v2473_v21 = vadd.f32 %v2472_v17, %v2432_v15 }
 0x273   :  { %v2474_v22 = vpop.f32.mrf.mxu1 }
 0x274   :  { %v2475_v23 = vadd.f32 %v2474_v22, %v2434_v18  ;;  %v2561_v24 = vmax.f32 %v2473_v21, 0.0 }
 0x275   :  { %v2476_v25 = vpop.f32.mrf.mxu1 }
 0x276   :  { %v2562_v26 = vmax.f32 %v2475_v23, 0.0  ;;  %v2565_v29 = vpack.c.bf16 %v2561_v24, %v2561_v24 }
 0x277   :  { %v2477_v27 = vpop.f32.mrf.mxu1 }
 0x278   :  { %v2566_v28 = vpack.c.bf16 %v2562_v26, %v2562_v26 }
 0x27a   :  { %2864 = vmatprep.mubr.bf16.mxu0 %v2566_v28 }
 0x27b   :  { %2865 = vmatmul.mubr.bf16.vlgmr.msra.gmra.mxu0 %v2565_v29 }
 0x2b1   :  { %v2554_v32 = vpop.f32.mrf.mxu1 }
 0x2b2   :  { %v2555_v34 = vadd.f32 %v2554_v32, %v2514_v30 }
 0x2b3   :  { %v2556_v16 = vpop.f32.mrf.mxu1 }
 0x2b4   :  { %v2557_v35 = vadd.f32 %v2556_v16, %v2516_v33  ;;  %v2563_v37 = vmax.f32 %v2555_v34, 0.0 }
 0x2b5   :  { %v2558_v20 = vpop.f32.mrf.mxu1 }
 0x2b6   :  { %v2564_v38 = vmax.f32 %v2557_v35, 0.0  ;;  %v2567_v42 = vpack.c.bf16 %v2563_v37, %v2563_v37 }
 0x2b7   :  { %v2559_v52 = vpop.f32.mrf.mxu1 }
 0x2b8   :  { %v2568_v19 = vpack.c.bf16 %v2564_v38, %v2564_v38 }
 0x2ba   :  { %2904 = vmatprep.mubr.bf16.mxu1 %v2568_v19 }
 0x2bb   :  { %2905 = vmatmul.mubr.bf16.vlgmr.msra.gmra.mxu1 %v2567_v42 }
 0x33b   :  { %v3295_v43 = vpop.f32.mrf.mxu0 }
 0x33d   :  { %v3296_v44 = vpop.f32.mrf.mxu0 }
 0x33e   :  { %v3297_v39 = vadd.f32 %v3296_v44, %v3295_v43 }
 0x33f   :  { %v3298_v31 = vpop.f32.mrf.mxu0 }
 0x340   :  { %v2867_v47 = vadd.f32 %v3297_v39, %v3246_v9 }
 0x341   :  { %v3299_v36 = vpop.f32.mrf.mxu0 }
 0x37b   :  { %v3317_v45 = vpop.f32.mrf.mxu1 }
 0x37d   :  { %v3318_v46 = vpop.f32.mrf.mxu1 }
 0x37e   :  { %v3319_v48 = vadd.f32 %v3318_v46, %v3317_v45 }
 0x37f   :  { %v3320_v49 = vpop.f32.mrf.mxu1 }
 0x380   :  { %v2907_v50 = vadd.f32 %v3319_v48, %v2867_v47 }
 0x381   :  { %v3321_v51 = vpop.f32.mrf.mxu1 }
 0x382   :  { %v2912_v53 = vpack.c.bf16 %v2907_v50, %v2907_v50 }
 0x384   :  { %2913 = vst [vmem:[%s4151_s7] sm:$0xf] %v2912_v53 }
 0x385   :  { %2918 = vsyncpa [#allocation3], 1 }
 0x386   :  { %2919 = vsyncpa [#allocation5], 1 }

</bundles_post_ra>
